<compile_context>
chip_gen: v7x
topology: tpu7x:2x2x1
jax: 0.10.0
libtpu: 0.0.40
codegen_flags: <defaults>
</compile_context>

<pallas_src>
import jax
import jax.numpy as jnp
from jax.experimental import pallas as pl
from jax.experimental.pallas import tpu as pltpu

IN_DIM = 32 * 32 * 3      # 3072
H_DIM = 200               # logical hidden width (module spec)
H_PAD = 256               # padded hidden width (clean (8,128) / MXU tiles)
OUT_DIM = 10
OUT_PAD = 128             # lane-dense padded logits width
_NEG_BIG = -1e30          # "-inf" bias for padded logit lanes (f32-safe)


def _round_up(x, m):
    return (x + m - 1) // m * m


# --------------------------------------------------------------------------- #
# Kernel
# --------------------------------------------------------------------------- #
def _fcnn_kernel(x_ref, w1_ref, b1_ref, w2_ref, b2_ref, w3_ref, b3_ref, o_ref):
    cd = w1_ref.dtype                                             # compute dtype

    # Cast fused into the kernel (no standalone HBM cast in the wrapper).
    x = x_ref[...].astype(cd)                                     # (TB, 3072)

    # fc1 + ReLU  (MXU matmul, f32 accumulation; pad lanes stay exactly 0)
    h1 = jnp.dot(x, w1_ref[...], preferred_element_type=jnp.float32)
    h1 = jnp.maximum(h1 + b1_ref[...], 0.0)                       # (TB, 256) f32

    # fc2 + ReLU
    h2 = jnp.dot(h1.astype(cd), w2_ref[...], preferred_element_type=jnp.float32)
    h2 = jnp.maximum(h2 + b2_ref[...], 0.0)                       # (TB, 256) f32

    # fc3 (padded to 128 lanes; pad lanes carry bias = -1e30)
    logits = jnp.dot(h2.astype(cd), w3_ref[...], preferred_element_type=jnp.float32)
    logits = logits + b3_ref[...]                                 # (TB, 128) f32

    # log_softmax over the lane axis; padded lanes never win the max and
    # contribute exp(shifted) == 0 to the denominator.
    m = jnp.max(logits, axis=-1, keepdims=True)
    shifted = logits - m
    lse = jnp.log(jnp.sum(jnp.exp(shifted), axis=-1, keepdims=True))
    o_ref[...] = (shifted - lse).astype(o_ref.dtype)              # lane-dense store


# --------------------------------------------------------------------------- #
# One-time weight prep (hoisted out of the forward path)
# --------------------------------------------------------------------------- #
def prepare_params(params, compute_dtype=jnp.bfloat16):
    """Cast + pad the Linear params once.  Hidden dim 200 -> 256 (zeros, exact
    under ReLU); logit dim 10 -> 128 (zero weights, -1e30 bias)."""
    cd = compute_dtype

    w1 = jnp.zeros((IN_DIM, H_PAD), cd).at[:, :H_DIM].set(
        params["w1"].astype(cd))
    w2 = jnp.zeros((H_PAD, H_PAD), cd).at[:H_DIM, :H_DIM].set(
        params["w2"].astype(cd))
    w3 = jnp.zeros((H_PAD, OUT_PAD), cd).at[:H_DIM, :OUT_DIM].set(
        params["w3"].astype(cd))
    b1 = jnp.zeros((1, H_PAD), jnp.float32).at[0, :H_DIM].set(
        params["b1"].astype(jnp.float32))
    b2 = jnp.zeros((1, H_PAD), jnp.float32).at[0, :H_DIM].set(
        params["b2"].astype(jnp.float32))
    b3 = jnp.full((1, OUT_PAD), _NEG_BIG, jnp.float32).at[0, :OUT_DIM].set(
        params["b3"].astype(jnp.float32))

    return {"w1": w1, "b1": b1, "w2": w2, "b2": b2, "w3": w3, "b3": b3}


def _weight_bytes(prepped):
    return sum(int(v.size) * v.dtype.itemsize for v in prepped.values())


def _vmem_estimate(tb, x_itemsize, weight_bytes):
    # double-buffered x stream + double-buffered out stream + resident weights
    return (2 * tb * IN_DIM * x_itemsize
            + 2 * tb * OUT_PAD * 4
            + 2 * weight_bytes)


# --------------------------------------------------------------------------- #
# Forward
# --------------------------------------------------------------------------- #
def fcnn_forward(x, prepped, *, block_b=1024):
    """x: (B, 3072) in f32 or bf16 (streamed as-is, cast in-kernel).
    prepped: output of prepare_params().  Returns (B, 10) f32 log-probs."""
    B = x.shape[0]
    x_itemsize = jnp.dtype(x.dtype).itemsize
    wbytes = _weight_bytes(prepped)

    # Batch tile: sublane-aligned, >= 2 grid steps when possible (v7x megacore),
    # clamped so double-buffered streams + weights fit comfortably in VMEM.
    TB = min(block_b, _round_up(max(pl.cdiv(B, 2), 1), 8))
    TB = max(8, _round_up(TB, 8))
    while TB > 8 and _vmem_estimate(TB, x_itemsize, wbytes) > (56 << 20):
        TB = max(8, _round_up(TB // 2, 8))
    n_steps = pl.cdiv(B, TB)                # partial last block handled by Pallas

    vmem_limit = min(max(32 << 20, _vmem_estimate(TB, x_itemsize, wbytes) + (4 << 20)),
                     64 << 20)

    # Resident operands: same block index every grid step -> DMA'd once.
    const = lambda shape: pl.BlockSpec(shape, lambda i: (0,) * len(shape))

    out = pl.pallas_call(
        _fcnn_kernel,
        out_shape=jax.ShapeDtypeStruct((B, OUT_PAD), jnp.float32),
        grid_spec=pltpu.PrefetchScalarGridSpec(
            num_scalar_prefetch=0,
            grid=(n_steps,),
            in_specs=[
                pl.BlockSpec((TB, IN_DIM), lambda i: (i, 0)),   # x: streamed
                const((IN_DIM, H_PAD)), const((1, H_PAD)),      # fc1 resident
                const((H_PAD, H_PAD)), const((1, H_PAD)),       # fc2 resident
                const((H_PAD, OUT_PAD)), const((1, OUT_PAD)),   # fc3 resident
            ],
            out_specs=pl.BlockSpec((TB, OUT_PAD), lambda i: (i, 0)),
        ),
        compiler_params=pltpu.CompilerParams(
            dimension_semantics=("parallel",),
            vmem_limit_bytes=vmem_limit,
        ),
    )(x, prepped["w1"], prepped["b1"], prepped["w2"], prepped["b2"],
      prepped["w3"], prepped["b3"])

    # Module semantics require the (B, 10) slice; drop it if the consumer can
    # take the padded lane-dense (B, 128) layout directly.
    return out[:, :OUT_DIM]


# --------------------------------------------------------------------------- #
# Synthetic init + reference
# --------------------------------------------------------------------------- #
def init_params(key):
    """Synthetic init matching nn.Linear shapes.

    PyTorch stores Linear weight as (out, in); we store the transpose (in, out)
    so the kernel computes x @ W directly (same math as x @ weight.T)."""
    k1, k2, k3, k4, k5, k6 = jax.random.split(key, 6)

    def linear(kw, kb, fan_in, fan_out):
        bound = 1.0 / jnp.sqrt(fan_in)
        w = jax.random.uniform(kw, (fan_in, fan_out), jnp.float32, -bound, bound)
        b = jax.random.uniform(kb, (fan_out,), jnp.float32, -bound, bound)
        return w, b

    w1, b1 = linear(k1, k2, IN_DIM, H_DIM)
    w2, b2 = linear(k3, k4, H_DIM, H_DIM)
    w3, b3 = linear(k5, k6, H_DIM, OUT_DIM)
    return {"w1": w1, "b1": b1, "w2": w2, "b2": b2, "w3": w3, "b3": b3}


def _reference(x, p, compute_dtype=jnp.float32):
    cd = compute_dtype
    dot = lambda a, w: jnp.dot(a.astype(cd), w.astype(cd),
                               preferred_element_type=jnp.float32)
    h1 = jnp.maximum(dot(x, p["w1"]) + p["b1"], 0.0)
    h2 = jnp.maximum(dot(h1, p["w2"]) + p["b2"], 0.0)
    logits = dot(h2, p["w3"]) + p["b3"]
    return jax.nn.log_softmax(logits, axis=1)


if __name__ == "__main__":
    key = jax.random.PRNGKey(0)
    kx, kp = jax.random.split(key)

    B = 12  # exercises the Pallas partial final block (12 rows, TB=8, 2 steps)
    x = jax.random.normal(kx, (B, IN_DIM), dtype=jnp.float32)
    params = init_params(kp)

    # Default fast path: bf16 MXU matmuls, weights prepped once, x streamed
    # f32 and cast in-kernel (no wrapper-side cast/pad HBM round trips).
    prepped_bf16 = prepare_params(params, jnp.bfloat16)
    out = fcnn_forward(x, prepped_bf16, block_b=8)
    out = jax.block_until_ready(out)
    assert out.shape == (B, OUT_DIM), out.shape
    assert bool(jnp.all(jnp.isfinite(out)))
    ref_bf16 = _reference(x, params, compute_dtype=jnp.bfloat16)
    err = float(jnp.max(jnp.abs(out - ref_bf16)))
    assert err < 5e-3, err

    # f32 path: exact match to the original module's math (zero-padded hidden
    # lanes add exact zeros, so padding does not change the result).
    prepped_f32 = prepare_params(params, jnp.float32)
    out_f32 = fcnn_forward(x, prepped_f32, block_b=8)
    out_f32 = jax.block_until_ready(out_f32)
    ref_f32 = _reference(x, params)
    err_f32 = float(jnp.max(jnp.abs(out_f32 - ref_f32)))
    assert err_f32 < 1e-3, err_f32

    print("KERNEL_OK")
</pallas_src>

<mosaic_0001>
module attributes {stable_mosaic.version = 11 : i64} {
  func.func @_fcnn_kernel(%arg0: i32, %arg1: memref<8x3072xf32, #tpu.memory_space<vmem>>, %arg2: memref<3072x256xbf16, #tpu.memory_space<vmem>>, %arg3: memref<1x256xf32, #tpu.memory_space<vmem>>, %arg4: memref<256x256xbf16, #tpu.memory_space<vmem>>, %arg5: memref<1x256xf32, #tpu.memory_space<vmem>>, %arg6: memref<256x128xbf16, #tpu.memory_space<vmem>>, %arg7: memref<1x128xf32, #tpu.memory_space<vmem>>, %arg8: memref<8x128xf32, #tpu.memory_space<vmem>>) attributes {dimension_semantics = [#tpu.dimension_semantics<parallel>], iteration_bounds = array<i64: 2>, scalar_prefetch = 0 : i64, scratch_operands = 0 : i64, tpu.core_type = #tpu.core_type<tc>, window_params = [{transform_indices = @transform_0, window_bounds = array<i64: 8, 3072>}, {pipeline_mode = #tpu.pipeline_mode<synchronous>, transform_indices = @transform_1, window_bounds = array<i64: 3072, 256>}, {pipeline_mode = #tpu.pipeline_mode<synchronous>, transform_indices = @transform_2, window_bounds = array<i64: 1, 256>}, {pipeline_mode = #tpu.pipeline_mode<synchronous>, transform_indices = @transform_3, window_bounds = array<i64: 256, 256>}, {pipeline_mode = #tpu.pipeline_mode<synchronous>, transform_indices = @transform_4, window_bounds = array<i64: 1, 256>}, {pipeline_mode = #tpu.pipeline_mode<synchronous>, transform_indices = @transform_5, window_bounds = array<i64: 256, 128>}, {pipeline_mode = #tpu.pipeline_mode<synchronous>, transform_indices = @transform_6, window_bounds = array<i64: 1, 128>}, {transform_indices = @transform_7, window_bounds = array<i64: 8, 128>}]} {
    %c0 = arith.constant 0 : index
    %c0_0 = arith.constant 0 : index
    %0 = vector.load %arg1[%c0, %c0_0] : memref<8x3072xf32, #tpu.memory_space<vmem>>, vector<8x3072xf32>
    %1 = arith.truncf %0 : vector<8x3072xf32> to vector<8x3072xbf16>
    %c0_1 = arith.constant 0 : index
    %c0_2 = arith.constant 0 : index
    %2 = vector.load %arg2[%c0_1, %c0_2] : memref<3072x256xbf16, #tpu.memory_space<vmem>>, vector<3072x256xbf16>
    %cst = arith.constant dense<0.000000e+00> : vector<8x256xf32>
    %3 = tpu.matmul %1, %2, %cst {dimension_numbers = #tpu.dot_dimension_numbers<[1], [0], [0], [1], [0, 0, 1, 1], [], []>} : vector<8x3072xbf16>, vector<3072x256xbf16>, vector<8x256xf32> -> vector<8x256xf32>
    %c0_3 = arith.constant 0 : index
    %c0_4 = arith.constant 0 : index
    %4 = vector.load %arg3[%c0_3, %c0_4] : memref<1x256xf32, #tpu.memory_space<vmem>>, vector<1x256xf32>
    %5 = vector.broadcast %4 : vector<1x256xf32> to vector<8x256xf32>
    %6 = arith.addf %3, %5 : vector<8x256xf32>
    %cst_5 = arith.constant 0.000000e+00 : f32
    %7 = vector.broadcast %cst_5 : f32 to vector<8x256xf32>
    %8 = arith.maximumf %6, %7 : vector<8x256xf32>
    %9 = arith.truncf %8 : vector<8x256xf32> to vector<8x256xbf16>
    %c0_6 = arith.constant 0 : index
    %c0_7 = arith.constant 0 : index
    %10 = vector.load %arg4[%c0_6, %c0_7] : memref<256x256xbf16, #tpu.memory_space<vmem>>, vector<256x256xbf16>
    %cst_8 = arith.constant dense<0.000000e+00> : vector<8x256xf32>
    %11 = tpu.matmul %9, %10, %cst_8 {dimension_numbers = #tpu.dot_dimension_numbers<[1], [0], [0], [1], [0, 0, 1, 1], [], []>} : vector<8x256xbf16>, vector<256x256xbf16>, vector<8x256xf32> -> vector<8x256xf32>
    %c0_9 = arith.constant 0 : index
    %c0_10 = arith.constant 0 : index
    %12 = vector.load %arg5[%c0_9, %c0_10] : memref<1x256xf32, #tpu.memory_space<vmem>>, vector<1x256xf32>
    %13 = vector.broadcast %12 : vector<1x256xf32> to vector<8x256xf32>
    %14 = arith.addf %11, %13 : vector<8x256xf32>
    %cst_11 = arith.constant 0.000000e+00 : f32
    %15 = vector.broadcast %cst_11 : f32 to vector<8x256xf32>
    %16 = arith.maximumf %14, %15 : vector<8x256xf32>
    %17 = arith.truncf %16 : vector<8x256xf32> to vector<8x256xbf16>
    %c0_12 = arith.constant 0 : index
    %c0_13 = arith.constant 0 : index
    %18 = vector.load %arg6[%c0_12, %c0_13] : memref<256x128xbf16, #tpu.memory_space<vmem>>, vector<256x128xbf16>
    %cst_14 = arith.constant dense<0.000000e+00> : vector<8x128xf32>
    %19 = tpu.matmul %17, %18, %cst_14 {dimension_numbers = #tpu.dot_dimension_numbers<[1], [0], [0], [1], [0, 0, 1, 1], [], []>} : vector<8x256xbf16>, vector<256x128xbf16>, vector<8x128xf32> -> vector<8x128xf32>
    %c0_15 = arith.constant 0 : index
    %c0_16 = arith.constant 0 : index
    %20 = vector.load %arg7[%c0_15, %c0_16] : memref<1x128xf32, #tpu.memory_space<vmem>>, vector<1x128xf32>
    %21 = vector.broadcast %20 : vector<1x128xf32> to vector<8x128xf32>
    %22 = arith.addf %19, %21 : vector<8x128xf32>
    %cst_17 = arith.constant dense<0xFF800000> : vector<8xf32>
    %23 = vector.multi_reduction <maximumf>, %22, %cst_17 [1] : vector<8x128xf32> to vector<8xf32>
    %24 = vector.shape_cast %23 : vector<8xf32> to vector<8x1xf32>
    %25 = vector.broadcast %24 : vector<8x1xf32> to vector<8x128xf32>
    %26 = arith.subf %22, %25 : vector<8x128xf32>
    %27 = math.exp %26 : vector<8x128xf32>
    %cst_18 = arith.constant dense<0.000000e+00> : vector<8xf32>
    %28 = vector.multi_reduction <add>, %27, %cst_18 [1] : vector<8x128xf32> to vector<8xf32>
    %29 = vector.shape_cast %28 : vector<8xf32> to vector<8x1xf32>
    %30 = math.log %29 : vector<8x1xf32>
    %31 = vector.broadcast %30 : vector<8x1xf32> to vector<8x128xf32>
    %32 = arith.subf %26, %31 : vector<8x128xf32>
    %c0_19 = arith.constant 0 : index
    %c0_20 = arith.constant 0 : index
    %33 = vector.load %arg8[%c0_19, %c0_20] : memref<8x128xf32, #tpu.memory_space<vmem>>, vector<8x128xf32>
    tpu.vector_store %arg8[%c0_19, %c0_20], %32 {strides = array<i32>} : memref<8x128xf32, #tpu.memory_space<vmem>>, vector<8x128xf32>,
    return
  }
  func.func @transform_0(%arg0: i32) -> (i32, i32) {
    %c0_i32 = arith.constant 0 : i32
    %c0_i32_0 = arith.constant 0 : i32
    return %arg0, %c0_i32 : i32, i32
  }
  func.func @transform_1(%arg0: i32) -> (i32, i32) {
    %c0_i32 = arith.constant 0 : i32
    %c0_i32_0 = arith.constant 0 : i32
    %c0_i32_1 = arith.constant 0 : i32
    return %c0_i32, %c0_i32_0 : i32, i32
  }
  func.func @transform_2(%arg0: i32) -> (i32, i32) {
    %c0_i32 = arith.constant 0 : i32
    %c0_i32_0 = arith.constant 0 : i32
    %c0_i32_1 = arith.constant 0 : i32
    return %c0_i32, %c0_i32_0 : i32, i32
  }
  func.func @transform_3(%arg0: i32) -> (i32, i32) {
    %c0_i32 = arith.constant 0 : i32
    %c0_i32_0 = arith.constant 0 : i32
    %c0_i32_1 = arith.constant 0 : i32
    return %c0_i32, %c0_i32_0 : i32, i32
  }
  func.func @transform_4(%arg0: i32) -> (i32, i32) {
    %c0_i32 = arith.constant 0 : i32
    %c0_i32_0 = arith.constant 0 : i32
    %c0_i32_1 = arith.constant 0 : i32
    return %c0_i32, %c0_i32_0 : i32, i32
  }
  func.func @transform_5(%arg0: i32) -> (i32, i32) {
    %c0_i32 = arith.constant 0 : i32
    %c0_i32_0 = arith.constant 0 : i32
    %c0_i32_1 = arith.constant 0 : i32
    return %c0_i32, %c0_i32_0 : i32, i32
  }
  func.func @transform_6(%arg0: i32) -> (i32, i32) {
    %c0_i32 = arith.constant 0 : i32
    %c0_i32_0 = arith.constant 0 : i32
    %c0_i32_1 = arith.constant 0 : i32
    return %c0_i32, %c0_i32_0 : i32, i32
  }
  func.func @transform_7(%arg0: i32) -> (i32, i32) {
    %c0_i32 = arith.constant 0 : i32
    %c0_i32_0 = arith.constant 0 : i32
    return %arg0, %c0_i32 : i32, i32
  }
}

</mosaic_0001>

<bundles_post_ra>
// kernel: tpu_custom_call.1
= control target key start
LH: loop header
LB: loop body
LE: loop exit
PB: predicated region body
PF: predicated region fallthrough
CT: control target
= control target key end

     0   :  { %s5763_s0 = inlined_call_operand.hbm [shape: f32[12,3072], index: 0, kind: input, shape index: {}]   ;;  %s5764_s1 = inlined_call_operand.hbm [shape: bf16[3072,256], index: 1, kind: input, shape index: {}]   ;;  %s5765_s2 = inlined_call_operand.hbm [shape: f32[1,256], index: 2, kind: input, shape index: {}]   ;;  %s5766_s3 = inlined_call_operand.hbm [shape: bf16[256,256], index: 3, kind: input, shape index: {}]   ;;  %s5767_s4 = inlined_call_operand.hbm [shape: f32[1,256], index: 4, kind: input, shape index: {}]   ;;  %s5768_s5 = inlined_call_operand.hbm [shape: bf16[256,128], index: 5, kind: input, shape index: {}]   ;;  %s5769_s6 = inlined_call_operand.hbm [shape: f32[1,128], index: 6, kind: input, shape index: {}]   ;;  %s5770_s7 = inlined_call_operand.hbm [shape: f32[12,128], index: 7, kind: output, shape index: {}]  }
   0x1   :  { %5774 = sst [smem:[#allocation20_spill]] %s5764_s1 }
   0x2   :  { %12 = vsyncpa [#allocation3], 0 }
   0x3   :  { %14 = vsyncpa [#allocation3 + $0x1], 0 }
   0x4   :  { %15 = vsyncpa [#allocation6], 0 }
   0x5   :  { %16 = vsyncpa [#allocation9], 0 }
   0x6   :  { %17 = vsyncpa [#allocation12], 0 }
   0x7   :  { %18 = vsyncpa [#allocation4], 0 }
   0x8   :  { %20 = vsyncpa [#allocation4 + $0x1], 0  ;;  %s5422_s24 = smov 0   ;;  %s5424_s25 = smov 0  }
   0x9   :  { %s5426_s26 = smov 0   ;;  %s5428_s27 = smov 0  }
   0xa LB: > { %s5370_s28 = smov [#allocation5]   ;;  %s5443_s30 = sadd.s32 4294967295, %s5368_s27   ;;  %s5368_s27 = sphi %s5428_s27, %s5797_s27   ;;  %s5364_s26 = sphi %s5426_s26, %s5796_s26   ;;  %s5360_s25 = sphi %s5424_s25, %s5795_s25   ;;  %s5356_s24 = sphi %s5422_s24, %s5794_s24  }
   0xb   : > { %s221_s29 = sshll.u32 %s5370_s28, 4  ;;  %p3814_p0 = scmp.ge.s32.totalorder %s5368_s27, 1  ;;  %s5448_s29 = int_to_ptr.vmem [resolvable:$true] %s221_s29 }
   0xc   : > { %p5771_p1 = scmp.eq.s32.totalorder %s5443_s30, 0  ;;  %p209_p2 = scmp.lt.s32.totalorder %s5368_s27, 3 }
   0xd   : > { %s5371_s9 = smov [#allocation8]   ;;  %s5372_s12 = smov [#allocation11]  }
   0xe   : > { %p5450_p3 = pnand %p3814_p0, %p209_p2  ;;  %s245_s10 = sshll.u32 %s5371_s9, 4  ;;  %s5463_s10 = int_to_ptr.vmem [resolvable:$true] %s245_s10 }
   0xf   : > { %s269_s13 = sshll.u32 %s5372_s12, 4  ;;  %s5777_s1 = sld [smem:[#allocation20_spill]]  ;;  %s5465_s13 = int_to_ptr.vmem [resolvable:$true] %s269_s13 }
  0x10   : > { %s5775_s8 = scalar_select %p5450_p3, 1, 0 }
  0x11   : > { %p4365_p5 = pneg %p5450_p3 }
  0x13   : > { %p5459_p6 = pnand %p4365_p5, %p5771_p1 }
  0x15   : > { %s5092_s16 = scalar_lea.hbm %s5777_s1, 49152  ;;  %p5475_p8 = pneg %p5459_p6 }
  0x16   : > { %p5093_p7 = scmp.ne.s32.totalorder %s5777_s1, %s5092_s16  ;;  %p5099_p11 = scmp.lt.u32.totalorder %s5092_s16, %s5777_s1 }
  0x18   : > { %p5095_p9 = pnand %p5475_p8, %p5093_p7 }
  0x1a   : > { %p5096_p10 = pneg %p5095_p9 }
  0x1c   : > { %p5101_p12 = pnand %p5099_p11, %p5096_p10 }
  0x1e   : > { %5104 = shalt.err (!%p5101_p12)
}
  0x1f   : > { %s5105_s22 = scalar_lea.vmem %s5448_s29, 49152  ;;  %p5113_p5 = scmp.lt.s32.totalorder %s5448_s29, %s5448_s29 }
  0x20   : > { %p5106_p13 = scmp.ne.s32.totalorder %s5448_s29, %s5105_s22  ;;  %p5114_p4 = scmp.lt.s32.totalorder %s5105_s22, %s5105_s22 }
  0x22   : > { %p5108_p0 = pnand %p5106_p13, %p5475_p8  ;;  %p5115_p7 = por %p5114_p4, %p5113_p5 }
  0x24   : > { %p5109_p2 = pneg %p5108_p0 }
  0x26   : > { %p5116_p9 = pnand %p5115_p7, %p5109_p2 }
  0x28   : > { %5119 = shalt.err (!%p5116_p9)
}
  0x29   : > { %s5373_s23 = smov 128   ;;  %s5374_s28 = smov 8  }
  0x2a   : > { %4368 = dma.hbm_to_vmem [thread:$0]  (!%p5459_p6), %s5777_s1, 49152, %s5448_s29, [#allocation6], %s5373_s23, %s5373_s23, %s5374_s28  }
  0x2b   : > { %s5120_s16 = scalar_lea.hbm %s5766_s3, 4096 }
  0x2c   : > { %p5121_p4 = scmp.ne.s32.totalorder %s5766_s3, %s5120_s16  ;;  %p5127_p12 = scmp.lt.u32.totalorder %s5120_s16, %s5766_s3 }
  0x2e   : > { %p5123_p10 = pnand %p5121_p4, %p5475_p8 }
  0x30   : > { %p5124_p11 = pneg %p5123_p10 }
  0x32   : > { %p5129_p13 = pnand %p5127_p12, %p5124_p11 }
  0x34   : > { %5132 = shalt.err (!%p5129_p13)
}
  0x35   : > { %s5133_s29 = scalar_lea.vmem %s5463_s10, 4096  ;;  %p5141_p7 = scmp.lt.s32.totalorder %s5463_s10, %s5463_s10 }
  0x36   : > { %p5134_p0 = scmp.ne.s32.totalorder %s5463_s10, %s5133_s29  ;;  %p5142_p9 = scmp.lt.s32.totalorder %s5133_s29, %s5133_s29 }
  0x38   : > { %p5136_p2 = pnand %p5134_p0, %p5475_p8  ;;  %p5143_p4 = por %p5142_p9, %p5141_p7 }
  0x3a   : > { %p5137_p5 = pneg %p5136_p2 }
  0x3c   : > { %p5144_p10 = pnand %p5143_p4, %p5137_p5 }
  0x3e   : > { %5147 = shalt.err (!%p5144_p10)
}
  0x3f   : > { %4374 = dma.hbm_to_vmem [thread:$0]  (!%p5459_p6), %s5766_s3, 4096, %s5463_s10, [#allocation9], %s5373_s23, %s5373_s23, %s5374_s28  }
  0x40   : > { %s5148_s15 = scalar_lea.hbm %s5768_s5, 2048 }
  0x41   : > { %p5149_p11 = scmp.ne.s32.totalorder %s5768_s5, %s5148_s15  ;;  %p5155_p0 = scmp.lt.u32.totalorder %s5148_s15, %s5768_s5 }
  0x43   : > { %p5151_p12 = pnand %p5149_p11, %p5475_p8 }
  0x45   : > { %p5152_p13 = pneg %p5151_p12 }
  0x47   : > { %p5157_p2 = pnand %p5155_p0, %p5152_p13 }
  0x49   : > { %5160 = shalt.err (!%p5157_p2)
}
  0x4a   : > { %s5161_s10 = scalar_lea.vmem %s5465_s13, 2048  ;;  %p5169_p4 = scmp.lt.s32.totalorder %s5465_s13, %s5465_s13 }
  0x4b   : > { %p5162_p5 = scmp.ne.s32.totalorder %s5465_s13, %s5161_s10  ;;  %p5170_p10 = scmp.lt.s32.totalorder %s5161_s10, %s5161_s10 }
  0x4d   : > { %p5164_p7 = pnand %p5162_p5, %p5475_p8  ;;  %p5171_p11 = por %p5170_p10, %p5169_p4 }
  0x4f   : > { %p5165_p9 = pneg %p5164_p7 }
  0x51   : > { %p5172_p12 = pnand %p5171_p11, %p5165_p9 }
  0x53   : > { %5175 = shalt.err (!%p5172_p12)
}
  0x54   : > { %s5375_s23 = smov 64   ;;  %s5376_s28 = smov 4  }
  0x55   : > { %4380 = dma.hbm_to_vmem [thread:$0]  (!%p5459_p6), %s5768_s5, 2048, %s5465_s13, [#allocation12], %s5375_s23, %s5375_s23, %s5376_s28  }
  0x56   : > { %s5377_s22 = smov [#allocation7]   ;;  %s5378_s12 = smov [#allocation10]  }
  0x57   : > { %s235_s9 = sshll.u32 %s5377_s22, 4  ;;  %s259_s14 = sshll.u32 %s5378_s12, 4  ;;  %s236_s9 = int_to_ptr.vmem [resolvable:$true] %s235_s9  ;;  %s260_s14 = int_to_ptr.vmem [resolvable:$true] %s259_s14 }
  0x58   : > { %s5176_s17 = scalar_lea.hbm %s5765_s2, 32 }
  0x59   : > { %p5177_p13 = scmp.ne.s32.totalorder %s5765_s2, %s5176_s17  ;;  %p5183_p5 = scmp.lt.u32.totalorder %s5176_s17, %s5765_s2 }
  0x5b   : > { %p5179_p0 = pnand %p5177_p13, %p5475_p8 }
  0x5d   : > { %p5180_p2 = pneg %p5179_p0 }
  0x5f   : > { %p5185_p7 = pnand %p5183_p5, %p5180_p2 }
  0x61   : > { %5188 = shalt.err (!%p5185_p7)
}
  0x62   : > { %s5189_s13 = scalar_lea.vmem %s236_s9, 32  ;;  %p5197_p11 = scmp.lt.s32.totalorder %s236_s9, %s236_s9 }
  0x63   : > { %p5190_p9 = scmp.ne.s32.totalorder %s236_s9, %s5189_s13  ;;  %p5198_p12 = scmp.lt.s32.totalorder %s5189_s13, %s5189_s13 }
  0x65   : > { %p5192_p4 = pnand %p5190_p9, %p5475_p8  ;;  %p5199_p1 = por %p5198_p12, %p5197_p11 }
  0x67   : > { %p5193_p10 = pneg %p5192_p4 }
  0x69   : > { %p5200_p3 = pnand %p5199_p1, %p5193_p10 }
  0x6b   : > { %5203 = shalt.err (!%p5200_p3)
}
  0x6c   : > { %4371 = dma.hbm_to_vmem [thread:$0]  (!%p5459_p6), %s5765_s2, 32, %s236_s9, [#allocation6]  }
  0x6d   : > { %s5204_s29 = scalar_lea.hbm %s5767_s4, 32 }
  0x6e   : > { %p5205_p13 = scmp.ne.s32.totalorder %s5767_s4, %s5204_s29  ;;  %p5211_p3 = scmp.lt.u32.totalorder %s5204_s29, %s5767_s4 }
  0x70   : > { %p5207_p0 = pnand %p5205_p13, %p5475_p8 }
  0x72   : > { %p5208_p1 = pneg %p5207_p0 }
  0x74   : > { %p5213_p2 = pnand %p5211_p3, %p5208_p1 }
  0x76   : > { %5216 = shalt.err (!%p5213_p2)
}
  0x77   : > { %s5217_s17 = scalar_lea.vmem %s260_s14, 32  ;;  %p5225_p4 = scmp.lt.s32.totalorder %s260_s14, %s260_s14 }
  0x78   : > { %p5218_p5 = scmp.ne.s32.totalorder %s260_s14, %s5217_s17  ;;  %p5226_p10 = scmp.lt.s32.totalorder %s5217_s17, %s5217_s17 }
  0x7a   : > { %p5220_p7 = pnand %p5218_p5, %p5475_p8  ;;  %p5227_p11 = por %p5226_p10, %p5225_p4 }
  0x7c   : > { %p5221_p9 = pneg %p5220_p7 }
  0x7e   : > { %p5228_p12 = pnand %p5227_p11, %p5221_p9 }
  0x80   : > { %5231 = shalt.err (!%p5228_p12)
}
  0x81   : > { %4377 = dma.hbm_to_vmem [thread:$0]  (!%p5459_p6), %s5767_s4, 32, %s260_s14, [#allocation9]  }
  0x82   : > { %s5379_s20 = smov [#allocation13]   ;;  %s5232_s28 = scalar_lea.hbm %s5769_s6, 16 }
  0x83   : > { %s283_s10 = sshll.u32 %s5379_s20, 4  ;;  %p5233_p13 = scmp.ne.s32.totalorder %s5769_s6, %s5232_s28  ;;  %s284_s10 = int_to_ptr.vmem [resolvable:$true] %s283_s10 }
  0x84   : > { %p5239_p3 = scmp.lt.u32.totalorder %s5232_s28, %s5769_s6 }
  0x85   : > { %p5235_p0 = pnand %p5233_p13, %p5475_p8 }
  0x87   : > { %p5236_p1 = pneg %p5235_p0 }
  0x89   : > { %p5241_p2 = pnand %p5239_p3, %p5236_p1 }
  0x8b   : > { %5244 = shalt.err (!%p5241_p2)
}
  0x8c   : > { %s5245_s14 = scalar_lea.vmem %s284_s10, 16  ;;  %s5252_s12 = scalar_lea.vmem %s284_s10, 32 }
  0x8d   : > { %p5246_p5 = scmp.ne.s32.totalorder %s284_s10, %s5245_s14  ;;  %p5253_p4 = scmp.lt.s32.totalorder %s284_s10, %s284_s10 }
  0x8e   : > { %p5254_p10 = scmp.lt.s32.totalorder %s5252_s12, %s5245_s14 }
  0x8f   : > { %p5248_p7 = pnand %p5246_p5, %p5475_p8 }
  0x90   : > { %p5255_p11 = por %p5254_p10, %p5253_p4 }
  0x91   : > { %p5249_p9 = pneg %p5248_p7 }
  0x93   : > { %p5256_p12 = pnand %p5255_p11, %p5249_p9 }
  0x95   : > { %5259 = shalt.err (!%p5256_p12)
}
  0x96   : > { %4383 = dma.hbm_to_vmem [thread:$0]  (!%p5459_p6), %s5769_s6, 16, %s284_s10, [#allocation12]  }
  0x97   : > { %s3813_s19 = sadd.s32 4294967294, %s5368_s27   ;;  %s5598_s11 = sadd.s32 1, %s5368_s27  }
  0x98   : > { %s30_s17 = ssub.s32 %s5368_s27, %s5598_s11  ;;  %s33_s9 = sadd.s32 1, %s5364_s26 }
  0x99   : > { %p31_p8 = scmp.eq.s32.totalorder %s30_s17, 0  ;;  %p40_p13 = scmp.ne.s32.totalorder %s5364_s26, %s5360_s25 }
  0x9a   : > { %p41_p0 = scmp.eq.s32.totalorder %s5368_s27, 0  ;;  %p46_p1 = scmp.ne.s32.totalorder %s5360_s25, %s5356_s24 }
  0x9b   : > { %s5609_s18 = scalar_select %p31_p8, %s5364_s26, %s33_s9  }
  0x9c   : > { %p42_p3 = por %p41_p0, %p40_p13  ;;  %p5779_p2 = scmp.eq.s32.totalorder %s5443_s30, 0 }
  0x9d   : > { %p196_p6 = scmp.eq.s32.totalorder %s5443_s30, 1  ;;  %p202_p7 = scmp.eq.s32.totalorder %s3813_s19, 1 }
  0x9e   : > { %p5613_p5 = por %p5779_p2, %p46_p1  ;;  %p4398_p9 = scmp.lt.s32.totalorder %s5368_s27, 2 }
  0x9f   : > { %s294_s10 = sand.u32 1, %s5364_s26   ;;  %p5620_p4 = por %p196_p6, %p40_p13 }
  0xa0   : > { %p5624_p10 = por %p202_p7, %p46_p1  ;;  %s4334_s28 = smul.u32 192, %s294_s10 }
  0xa1   : > { %s5781_s13 = scalar_select %p5620_p4, 1, 0 }
  0xa2   : > { %s5782_s23 = scalar_select %p5624_p10, 1, 0 }
  0xa3   : > { %s4335_s1 = smul.u32 3072, %s5368_s27  ;;  %p5629_p11 = pnand %p4398_p9, %p42_p3 }
  0xa4   : > { %s298_s12 = scalar_lea.vmem [#allocation2], %s4334_s28  ;;  %s295_s16 = scalar_lea.sflag [#allocation3], %s294_s10 }
  0xa5   : > { %s5636_s14 = scalar_lea.hbm %s5763_s0, %s4335_s1  ;;  %s306_s15 = sshll.u32 %s298_s12, 4  ;;  %s5638_s15 = int_to_ptr.vmem [resolvable:$true] %s306_s15 }
  0xa6   : > { %s5260_s19 = scalar_lea.hbm %s5636_s14, 3072  ;;  %p5262_p8 = pneg %p5629_p11 }
  0xa7   : > { %p5261_p12 = scmp.ne.s32.totalorder %s5636_s14, %s5260_s19  ;;  %s5265_s1 = scalar_lea.hbm %s5763_s0, 6144 }
  0xa8   : > { %p5266_p1 = scmp.lt.u32.totalorder %s5636_s14, %s5763_s0  ;;  %p5267_p3 = scmp.lt.u32.totalorder %s5265_s1, %s5260_s19 }
  0xa9   : > { %p5263_p13 = pnand %p5262_p8, %p5261_p12  ;;  %p5269_p6 = scmp.lt.u32.totalorder %s5260_s19, %s5636_s14 }
  0xaa   : > { %p5268_p2 = por %p5267_p3, %p5266_p1 }
  0xab   : > { %p5264_p0 = pneg %p5263_p13 }
  0xac   : > { %p5270_p7 = por %p5269_p6, %p5268_p2 }
  0xae   : > { %p5271_p9 = pnand %p5270_p7, %p5264_p0 }
  0xb0   : > { %5274 = shalt.err (!%p5271_p9)
}
  0xb1   : > { %s5275_s10 = scalar_lea.vmem %s5638_s15, 3072  ;;  %s5380_s28 = smov [#allocation2]  }
  0xb2   : > { %p5276_p12 = scmp.ne.s32.totalorder %s5638_s15, %s5275_s10  ;;  %s5280_s12 = sshll.u32 %s5380_s28, 4  ;;  %s5281_s12 = int_to_ptr.vmem [resolvable:$false] %s5280_s12 }
  0xb3   : > { %s5282_s17 = scalar_lea.vmem %s5281_s12, 6144  ;;  %p5283_p4 = scmp.lt.s32.totalorder %s5638_s15, %s5281_s12 }
  0xb4   : > { %p5278_p13 = pnand %p5276_p12, %p5262_p8  ;;  %p5284_p1 = scmp.lt.s32.totalorder %s5282_s17, %s5275_s10 }
  0xb6   : > { %p5279_p10 = pneg %p5278_p13  ;;  %p5285_p3 = por %p5284_p1, %p5283_p4 }
  0xb8   : > { %p5286_p2 = pnand %p5285_p3, %p5279_p10 }
  0xba   : > { %5289 = shalt.err (!%p5286_p2)
}
  0xbb   : > { %4387 = dma.hbm_to_vmem [thread:$0]  (!%p5629_p11), %s5636_s14, 3072, %s5638_s15, %s295_s16  }
  0xbc   : > { %p5784_p0 = scmp.ne.s32.totalorder %s5775_s8, 0 }
  0xbd   : > { %s5668_s19 = sand.u32 (!%p5784_p0), 1, %s5360_s25  }
  0xbe   : > { %315 = sbr.rel (%p5784_p0) target bundleno = 1642 (0x66a), region = 48  ;;  %s318_s1 = scalar_lea.sflag (!%p5784_p0), [#allocation3], %s5668_s19 }
  0xbf   : > { %s4336_s9 = smul.u32 (!%p5784_p0), 192, %s5668_s19 }
  0xc1   : > { %s5672_s29 = scalar_lea.vmem (!%p5784_p0), [#allocation2], %s4336_s9 }
  0xc5   : > { %5335 = dma.done.wait (%p5613_p5), %s318_s1, 3072  }
  0xc6   : > { %5337 = vsyncadd (%p5613_p5), %s318_s1, 4294964224  ;;  %p5785_p4 = scmp.eq.s32.totalorder %s5443_s30, 0 }
  0xc8   : > { %5339 = dma.done.wait (%p5785_p4), [#allocation6], 49184   ;;  %p5786_p10 = pmov %p5785_p4 }
  0xc9   : > { %p5787_p11 = pmov %p5785_p4 }
  0xca   : > { %5341 = vsyncadd (%p5786_p10), [#allocation6], 4294918112 }
  0xcb   : > { %5343 = dma.done.wait (%p5787_p11), [#allocation9], 4128   ;;  %p5788_p8 = pmov %p5785_p4 }
  0xcc   : > { %p5789_p6 = pmov %p5785_p4 }
  0xcd   : > { %5345 = vsyncadd (%p5788_p8), [#allocation9], 4294963168 }
  0xce   : > { %5347 = dma.done.wait (%p5789_p6), [#allocation12], 2064   ;;  %p5790_p7 = pmov %p5785_p4 }
  0xcf   : > { %v4448_v0 = vld [vmem:[#allocation5 + $0x4] ss:$8 sps:$4 sm:$0xff]   ;;  %v4452_v2 = vld [vmem:[#allocation5] ss:$8 sps:$4 sm:$0xff]   ;;  %v4454_v4 = vld [vmem:[#allocation5 + $0x14] ss:$8 sps:$4 sm:$0xff]  }
  0xd0   : > { %5349 = vsyncadd (%p5790_p7), [#allocation12], 4294965232  ;;  %v4450_v1 = vld [vmem:[#allocation5 + $0x504] ss:$8 sps:$4 sm:$0xff]   ;;  %2741 = vmatprep.subr.bf16.mxu1 %v4448_v0  ;;  %v4453_v3 = vld [vmem:[#allocation5 + $0x500] ss:$8 sps:$4 sm:$0xff]  }
  0xd1   : > { %2946 = vmatprep.subr.bf16.mxu0 %v4450_v1  ;;  %2742 = vmatpush1.bf16.msra.mxu1 %v4452_v2  ;;  %v4456_v5 = vld [vmem:[#allocation5 + $0x514] ss:$8 sps:$4 sm:$0xff]   ;;  %v4458_v6 = vld [vmem:[#allocation5 + $0x10] ss:$8 sps:$4 sm:$0xff]   ;;  %v4460_v8 = vld [vmem:[#allocation5 + $0x24] ss:$8 sps:$4 sm:$0xff]  }
  0xd2   : > { %2947 = vmatpush1.bf16.msra.mxu0 %v4453_v3  ;;  %2743 = vmatprep.subr.bf16.mxu1 %v4454_v4  ;;  %v4459_v7 = vld [vmem:[#allocation5 + $0x510] ss:$8 sps:$4 sm:$0xff]   ;;  %v4462_v9 = vld [vmem:[#allocation5 + $0x524] ss:$8 sps:$4 sm:$0xff]   ;;  %v4464_v10 = vld [vmem:[#allocation5 + $0x20] ss:$8 sps:$4 sm:$0xff]  }
  0xd3   : > { %2948 = vmatprep.subr.bf16.mxu0 %v4456_v5  ;;  %v4465_v11 = vld [vmem:[#allocation5 + $0x520] ss:$8 sps:$4 sm:$0xff]   ;;  %v4466_v12 = vld [vmem:[#allocation5 + $0x34] ss:$8 sps:$4 sm:$0xff]   ;;  %v4470_v14 = vld [vmem:[#allocation5 + $0x30] ss:$8 sps:$4 sm:$0xff]  }
  0xd4   : > { %v4468_v13 = vld [vmem:[#allocation5 + $0x534] ss:$8 sps:$4 sm:$0xff]   ;;  %v4471_v15 = vld [vmem:[#allocation5 + $0x530] ss:$8 sps:$4 sm:$0xff]   ;;  %v4472_v16 = vld [vmem:[#allocation5 + $0x44] ss:$8 sps:$4 sm:$0xff]  }
  0xd5   : > { %2744 = vmatpush1.bf16.msra.mxu1 %v4458_v6  ;;  %v4474_v17 = vld [vmem:[#allocation5 + $0x544] ss:$8 sps:$4 sm:$0xff]   ;;  %v4476_v18 = vld [vmem:[#allocation5 + $0x40] ss:$8 sps:$4 sm:$0xff]   ;;  %v4478_v20 = vld [vmem:[#allocation5 + $0x54] ss:$8 sps:$4 sm:$0xff]  }
  0xd6   : > { %2949 = vmatpush1.bf16.msra.mxu0 %v4459_v7  ;;  %2745 = vmatprep.subr.bf16.mxu1 %v4460_v8  ;;  %v4477_v19 = vld [vmem:[#allocation5 + $0x540] ss:$8 sps:$4 sm:$0xff]   ;;  %v4480_v21 = vld [vmem:[#allocation5 + $0x554] ss:$8 sps:$4 sm:$0xff]   ;;  %v4482_v22 = vld [vmem:[#allocation5 + $0x50] ss:$8 sps:$4 sm:$0xff]  }
  0xd7   : > { %2950 = vmatprep.subr.bf16.mxu0 %v4462_v9  ;;  %v4483_v23 = vld [vmem:[#allocation5 + $0x550] ss:$8 sps:$4 sm:$0xff]   ;;  %v4484_v24 = vld [vmem:[#allocation5 + $0x64] ss:$8 sps:$4 sm:$0xff]   ;;  %v4488_v26 = vld [vmem:[#allocation5 + $0x60] ss:$8 sps:$4 sm:$0xff]  }
  0xd8   : > { %v4486_v25 = vld [vmem:[#allocation5 + $0x564] ss:$8 sps:$4 sm:$0xff]   ;;  %v4489_v27 = vld [vmem:[#allocation5 + $0x560] ss:$8 sps:$4 sm:$0xff]   ;;  %v4490_v28 = vld [vmem:[#allocation5 + $0x74] ss:$8 sps:$4 sm:$0xff]  }
  0xd9   : > { %2746 = vmatpush1.bf16.msra.mxu1 %v4464_v10  ;;  %v4492_v29 = vld [vmem:[#allocation5 + $0x574] ss:$8 sps:$4 sm:$0xff]   ;;  %v4494_v30 = vld [vmem:[#allocation5 + $0x70] ss:$8 sps:$4 sm:$0xff]   ;;  %v4496_v32 = vld [vmem:[#allocation5 + $0x84] ss:$8 sps:$4 sm:$0xff]  }
  0xda   : > { %2951 = vmatpush1.bf16.msra.mxu0 %v4465_v11  ;;  %2747 = vmatprep.subr.bf16.mxu1 %v4466_v12  ;;  %v4495_v31 = vld [vmem:[#allocation5 + $0x570] ss:$8 sps:$4 sm:$0xff]   ;;  %v4498_v33 = vld [vmem:[#allocation5 + $0x584] ss:$8 sps:$4 sm:$0xff]   ;;  %v4500_v34 = vld [vmem:[#allocation5 + $0x80] ss:$8 sps:$4 sm:$0xff]  }
  0xdb   : > { %2952 = vmatprep.subr.bf16.mxu0 %v4468_v13  ;;  %v4501_v35 = vld [vmem:[#allocation5 + $0x580] ss:$8 sps:$4 sm:$0xff]   ;;  %v4502_v36 = vld [vmem:[#allocation5 + $0x94] ss:$8 sps:$4 sm:$0xff]   ;;  %v4506_v38 = vld [vmem:[#allocation5 + $0x90] ss:$8 sps:$4 sm:$0xff]  }
  0xdc   : > { %v4504_v37 = vld [vmem:[#allocation5 + $0x594] ss:$8 sps:$4 sm:$0xff]   ;;  %v4507_v39 = vld [vmem:[#allocation5 + $0x590] ss:$8 sps:$4 sm:$0xff]   ;;  %v4508_v40 = vld [vmem:[#allocation5 + $0xa4] ss:$8 sps:$4 sm:$0xff]  }
  0xdd   : > { %2748 = vmatpush1.bf16.msra.mxu1 %v4470_v14  ;;  %v4510_v41 = vld [vmem:[#allocation5 + $0x5a4] ss:$8 sps:$4 sm:$0xff]   ;;  %v4512_v42 = vld [vmem:[#allocation5 + $0xa0] ss:$8 sps:$4 sm:$0xff]   ;;  %v4514_v44 = vld [vmem:[#allocation5 + $0xb4] ss:$8 sps:$4 sm:$0xff]  }
  0xde   : > { %2953 = vmatpush1.bf16.msra.mxu0 %v4471_v15  ;;  %2749 = vmatprep.subr.bf16.mxu1 %v4472_v16  ;;  %v4513_v43 = vld [vmem:[#allocation5 + $0x5a0] ss:$8 sps:$4 sm:$0xff]   ;;  %v4516_v45 = vld [vmem:[#allocation5 + $0x5b4] ss:$8 sps:$4 sm:$0xff]   ;;  %v4518_v47 = vld [vmem:[#allocation5 + $0xb0] ss:$8 sps:$4 sm:$0xff]  }
  0xdf   : > { %2954 = vmatprep.subr.bf16.mxu0 %v4474_v17  ;;  %v378_v46 = vld [vmem:[%s5672_s29 + $0x8] sm:$0xff]  ;;  %v4519_v49 = vld [vmem:[#allocation5 + $0x5b0] ss:$8 sps:$4 sm:$0xff]   ;;  %v4526_v56 = vld [vmem:[#allocation5 + $0xd4] ss:$8 sps:$4 sm:$0xff]   ;;  %s3830_s8 = sshll.u32 %s5668_s19, 3 }
  0xe0   : > { %v402_v48 = vpack.c.bf16 %v378_v46, %v378_v46  ;;  %v388_v50 = vld [vmem:[%s5672_s29 + $0x58] sm:$0xff]  ;;  %v4520_v51 = vld [vmem:[#allocation5 + $0xc4] ss:$8 sps:$4 sm:$0xff]   ;;  %v4524_v54 = vld [vmem:[#allocation5 + $0xc0] ss:$8 sps:$4 sm:$0xff]   ;;  %s4265_s20 = sshll.u32 %s5443_s30, 7 }
  0xe1   : > { %2750 = vmatpush1.bf16.msra.mxu1 %v4476_v18  ;;  %v4522_v52 = vld [vmem:[#allocation5 + $0x5c4] ss:$8 sps:$4 sm:$0xff]   ;;  %v412_v53 = vpack.c.bf16 %v388_v50, %v388_v50  ;;  %v4525_v55 = vld [vmem:[#allocation5 + $0x5c0] ss:$8 sps:$4 sm:$0xff]   ;;  %v4528_v57 = vld [vmem:[#allocation5 + $0x5d4] ss:$8 sps:$4 sm:$0xff]   ;;  %s5719_s22 = scalar_lea.hbm %s5770_s7, %s4265_s20 }
  0xe2   : > { %2955 = vmatpush1.bf16.msra.mxu0 %v4477_v19  ;;  %2751 = vmatprep.subr.bf16.mxu1 %v4478_v20  ;;  %v4530_v58 = vld [vmem:[#allocation5 + $0xd0] ss:$8 sps:$4 sm:$0xff]   ;;  %v4532_v60 = vld [vmem:[#allocation5 + $0xe4] ss:$8 sps:$4 sm:$0xff]   ;;  %v4536_v62 = vld [vmem:[#allocation5 + $0xe0] ss:$8 sps:$4 sm:$0xff]  }
  0xe3   : > { %2956 = vmatprep.subr.bf16.mxu0 %v4480_v21  ;;  %2773 = vmatprep.mubr.bf16.mxu1 %v402_v48  ;;  %v4531_v59 = vld [vmem:[#allocation5 + $0x5d0] ss:$8 sps:$4 sm:$0xff]   ;;  %v4534_v61 = vld [vmem:[#allocation5 + $0x5e4] ss:$8 sps:$4 sm:$0xff]   ;;  %v4537_v63 = vld [vmem:[#allocation5 + $0x5e0] ss:$8 sps:$4 sm:$0xff]  }
  0xe4   : > { %2978 = vmatprep.mubr.bf16.mxu0 %v412_v53  ;;  %v4538_v0 = vld [vmem:[#allocation5 + $0xf4] ss:$8 sps:$4 sm:$0xff]   ;;  %v4542_v2 = vld [vmem:[#allocation5 + $0xf0] ss:$8 sps:$4 sm:$0xff]   ;;  %v4546_v4 = vld [vmem:[#allocation5 + $0x104] ss:$8 sps:$4 sm:$0xff]  }
  0xe5   : > { %2752 = vmatpush1.bf16.msra.mxu1 %v4482_v22  ;;  %v4540_v1 = vld [vmem:[#allocation5 + $0x5f4] ss:$8 sps:$4 sm:$0xff]   ;;  %v4543_v3 = vld [vmem:[#allocation5 + $0x5f0] ss:$8 sps:$4 sm:$0xff]   ;;  %v377_v5 = vld [vmem:[%s5672_s29] sm:$0xff]  ;;  %s375_s21 = scalar_lea.vmem [#allocation14], %s3830_s8 }
  0xe6   : > { %2957 = vmatpush1.bf16.msra.mxu0 %v4483_v23  ;;  %2753 = vmatprep.subr.bf16.mxu1 %v4484_v24  ;;  %v387_v6 = vld [vmem:[%s5672_s29 + $0x50] sm:$0xff]  ;;  %v4549_v7 = vld [vmem:[#allocation5 + $0x604] ss:$8 sps:$4 sm:$0xff]   ;;  %v4544_v8 = vld [vmem:[#allocation5 + $0x100] ss:$8 sps:$4 sm:$0xff]   ;;  %v401_v10 = vpack.c.bf16 %v377_v5, %v377_v5  ;;  %s3686_s14 = sshll.u32 %s375_s21, 4  ;;  %s5721_s14 = int_to_ptr.vmem [resolvable:$true] %s3686_s14 }
  0xe7   : > { %2958 = vmatprep.subr.bf16.mxu0 %v4486_v25  ;;  %v4547_v9 = vld [vmem:[#allocation5 + $0x600] ss:$8 sps:$4 sm:$0xff]   ;;  %v411_v11 = vpack.c.bf16 %v387_v6, %v387_v6  ;;  %v4552_v12 = vld [vmem:[#allocation5 + $0x114] ss:$8 sps:$4 sm:$0xff]   ;;  %v4550_v14 = vld [vmem:[#allocation5 + $0x110] ss:$8 sps:$4 sm:$0xff]  }
  0xe8   : > { %v4555_v13 = vld [vmem:[#allocation5 + $0x614] ss:$8 sps:$4 sm:$0xff]   ;;  %v4553_v15 = vld [vmem:[#allocation5 + $0x610] ss:$8 sps:$4 sm:$0xff]   ;;  %v4558_v16 = vld [vmem:[#allocation5 + $0x124] ss:$8 sps:$4 sm:$0xff]  }
  0xe9   : > { %2754 = vmatpush1.bf16.msra.mxu1 %v4488_v26  ;;  %v4561_v17 = vld [vmem:[#allocation5 + $0x624] ss:$8 sps:$4 sm:$0xff]   ;;  %v4556_v18 = vld [vmem:[#allocation5 + $0x120] ss:$8 sps:$4 sm:$0xff]   ;;  %v4564_v20 = vld [vmem:[#allocation5 + $0x134] ss:$8 sps:$4 sm:$0xff]  }
  0xea   : > { %2959 = vmatpush1.bf16.msra.mxu0 %v4489_v27  ;;  %2755 = vmatprep.subr.bf16.mxu1 %v4490_v28  ;;  %v4559_v19 = vld [vmem:[#allocation5 + $0x620] ss:$8 sps:$4 sm:$0xff]   ;;  %v4567_v21 = vld [vmem:[#allocation5 + $0x634] ss:$8 sps:$4 sm:$0xff]   ;;  %v4562_v22 = vld [vmem:[#allocation5 + $0x130] ss:$8 sps:$4 sm:$0xff]  }
  0xeb   : > { %2960 = vmatprep.subr.bf16.mxu0 %v4492_v29  ;;  %v4565_v23 = vld [vmem:[#allocation5 + $0x630] ss:$8 sps:$4 sm:$0xff]   ;;  %v4570_v24 = vld [vmem:[#allocation5 + $0x144] ss:$8 sps:$4 sm:$0xff]   ;;  %v4568_v26 = vld [vmem:[#allocation5 + $0x140] ss:$8 sps:$4 sm:$0xff]  }
  0xec   : > { %v4573_v25 = vld [vmem:[#allocation5 + $0x644] ss:$8 sps:$4 sm:$0xff]   ;;  %v4571_v27 = vld [vmem:[#allocation5 + $0x640] ss:$8 sps:$4 sm:$0xff]   ;;  %v4576_v28 = vld [vmem:[#allocation5 + $0x154] ss:$8 sps:$4 sm:$0xff]  }
  0xed   : > { %2756 = vmatpush1.bf16.msra.mxu1 %v4494_v30  ;;  %v4579_v29 = vld [vmem:[#allocation5 + $0x654] ss:$8 sps:$4 sm:$0xff]   ;;  %v4574_v30 = vld [vmem:[#allocation5 + $0x150] ss:$8 sps:$4 sm:$0xff]   ;;  %v4592_v46 = vld [vmem:[#allocation5 + $0x180] ss:$8 sps:$4 sm:$0xff]  }
  0xee   : > { %2961 = vmatpush1.bf16.msra.mxu0 %v4495_v31  ;;  %2757 = vmatprep.subr.bf16.mxu1 %v4496_v32  ;;  %v4577_v31 = vld [vmem:[#allocation5 + $0x650] ss:$8 sps:$4 sm:$0xff]   ;;  %v4582_v32 = vld [vmem:[#allocation5 + $0x164] ss:$8 sps:$4 sm:$0xff]   ;;  %v4600_v48 = vld [vmem:[#allocation5 + $0x194] ss:$8 sps:$4 sm:$0xff]  }
  0xef   : > { %2962 = vmatprep.subr.bf16.mxu0 %v4498_v33  ;;  %v4585_v33 = vld [vmem:[#allocation5 + $0x664] ss:$8 sps:$4 sm:$0xff]   ;;  %v4598_v50 = vld [vmem:[#allocation5 + $0x190] ss:$8 sps:$4 sm:$0xff]   ;;  %v4628_v6 = vld [vmem:[#allocation5 + $0x1e0] ss:$8 sps:$4 sm:$0xff]  }
  0xf0   : > { %v4609_v53 = vld [vmem:[#allocation5 + $0x6a4] ss:$8 sps:$4 sm:$0xff]   ;;  %s3673_s10 = scalar_lea.sflag [#allocation4], %s5668_s19  ;;  %s5290_s28 = scalar_lea.vmem %s5721_s14, 128 }
  0xf1   : > { %2758 = vmatpush1.bf16.msra.mxu1 %v4500_v34  ;;  %v380_v34 = vld [vmem:[%s5672_s29 + $0x18] sm:$0xff]  ;;  %v4633_v5 = vld [vmem:[#allocation5 + $0x6e4] ss:$8 sps:$4 sm:$0xff]   ;;  %p5291_p5 = scmp.ne.s32.totalorder %s5721_s14, %s5290_s28  ;;  %p5791_p9 = scmp.ne.s32.totalorder %s5781_s13, 0 }
  0xf2   : > { %2963 = vmatpush1.bf16.msra.mxu0 %v4501_v35  ;;  %2759 = vmatprep.subr.bf16.mxu1 %v4502_v36  ;;  %v4580_v35 = vld [vmem:[#allocation5 + $0x160] ss:$8 sps:$4 sm:$0xff]   ;;  %v404_v36 = vpack.c.bf16 %v380_v34, %v380_v34  ;;  %v4658_v34 = vld [vmem:[#allocation5 + $0x230] ss:$8 sps:$4 sm:$0xff]   ;;  %s5381_s30 = smov [#allocation14]  }
  0xf3   : > { %2964 = vmatprep.subr.bf16.mxu0 %v4504_v37  ;;  %v4583_v37 = vld [vmem:[#allocation5 + $0x660] ss:$8 sps:$4 sm:$0xff]   ;;  %p5292_p12 = pnand %p5291_p5, %p5791_p9  ;;  %s5294_s12 = sshll.u32 %s5381_s30, 4  ;;  %s5295_s12 = int_to_ptr.vmem [resolvable:$false] %s5294_s12 }
  0xf4   : > { %s5296_s17 = scalar_lea.vmem %s5295_s12, 256  ;;  %p5297_p1 = scmp.lt.s32.totalorder %s5721_s14, %s5295_s12 }
  0xf5   : > { %2760 = vmatpush1.bf16.msra.mxu1 %v4506_v38  ;;  %v390_v38 = vld [vmem:[%s5672_s29 + $0x68] sm:$0xff]  ;;  %p5293_p13 = pneg %p5292_p12  ;;  %p5298_p3 = scmp.lt.s32.totalorder %s5296_s17, %s5290_s28 }
  0xf6   : > { %2965 = vmatpush1.bf16.msra.mxu0 %v4507_v39  ;;  %2761 = vmatprep.subr.bf16.mxu1 %v4508_v40  ;;  %v4588_v39 = vld [vmem:[#allocation5 + $0x174] ss:$8 sps:$4 sm:$0xff]  }
  0xf7   : > { %2966 = vmatprep.subr.bf16.mxu0 %v4510_v41  ;;  %v4591_v40 = vld [vmem:[#allocation5 + $0x674] ss:$8 sps:$4 sm:$0xff]   ;;  %v414_v41 = vpack.c.bf16 %v390_v38, %v390_v38  ;;  %v4664_v38 = vld [vmem:[#allocation5 + $0x240] ss:$8 sps:$4 sm:$0xff]   ;;  %p5299_p2 = por %p5298_p3, %p5297_p1 }
  0xf9   : > { %2762 = vmatpush1.bf16.msra.mxu1 %v4512_v42  ;;  %v4586_v42 = vld [vmem:[#allocation5 + $0x170] ss:$8 sps:$4 sm:$0xff]   ;;  %p5300_p0 = pnand %p5299_p2, %p5293_p13 }
  0xfa   : > { %2967 = vmatpush1.bf16.msra.mxu0 %v4513_v43  ;;  %2763 = vmatprep.subr.bf16.mxu1 %v4514_v44  ;;  %v4589_v43 = vld [vmem:[#allocation5 + $0x670] ss:$8 sps:$4 sm:$0xff]   ;;  %v4594_v44 = vld [vmem:[#allocation5 + $0x184] ss:$8 sps:$4 sm:$0xff]  }
  0xfb   : > { %2968 = vmatprep.subr.bf16.mxu0 %v4516_v45  ;;  %v4597_v45 = vld [vmem:[#allocation5 + $0x684] ss:$8 sps:$4 sm:$0xff]  }
  0xfd   : > { %2764 = vmatpush1.bf16.msra.mxu1 %v4518_v47  ;;  %v4595_v47 = vld [vmem:[#allocation5 + $0x680] ss:$8 sps:$4 sm:$0xff]  }
  0xfe   : > { %2969 = vmatpush1.bf16.msra.mxu0 %v4519_v49  ;;  %2765 = vmatprep.subr.bf16.mxu1 %v4520_v51  ;;  %v4603_v49 = vld [vmem:[#allocation5 + $0x694] ss:$8 sps:$4 sm:$0xff]   ;;  %v4601_v51 = vld [vmem:[#allocation5 + $0x690] ss:$8 sps:$4 sm:$0xff]  }
  0xff   : > { %2970 = vmatprep.subr.bf16.mxu0 %v4522_v52  ;;  %v4606_v52 = vld [vmem:[#allocation5 + $0x1a4] ss:$8 sps:$4 sm:$0xff]  }
 0x101   : > { %2766 = vmatpush1.bf16.msra.mxu1 %v4524_v54  ;;  %v4604_v54 = vld [vmem:[#allocation5 + $0x1a0] ss:$8 sps:$4 sm:$0xff]  }
 0x102   : > { %2971 = vmatpush1.bf16.msra.mxu0 %v4525_v55  ;;  %2767 = vmatprep.subr.bf16.mxu1 %v4526_v56  ;;  %v4607_v55 = vld [vmem:[#allocation5 + $0x6a0] ss:$8 sps:$4 sm:$0xff]   ;;  %v4612_v56 = vld [vmem:[#allocation5 + $0x1b4] ss:$8 sps:$4 sm:$0xff]  }
 0x103   : > { %2972 = vmatprep.subr.bf16.mxu0 %v4528_v57  ;;  %v4615_v57 = vld [vmem:[#allocation5 + $0x6b4] ss:$8 sps:$4 sm:$0xff]  }
 0x105   : > { %2768 = vmatpush1.bf16.msra.mxu1 %v4530_v58  ;;  %v4610_v58 = vld [vmem:[#allocation5 + $0x1b0] ss:$8 sps:$4 sm:$0xff]  }
 0x106   : > { %2973 = vmatpush1.bf16.msra.mxu0 %v4531_v59  ;;  %2769 = vmatprep.subr.bf16.mxu1 %v4532_v60  ;;  %v4613_v59 = vld [vmem:[#allocation5 + $0x6b0] ss:$8 sps:$4 sm:$0xff]   ;;  %v4618_v60 = vld [vmem:[#allocation5 + $0x1c4] ss:$8 sps:$4 sm:$0xff]  }
 0x107   : > { %2974 = vmatprep.subr.bf16.mxu0 %v4534_v61  ;;  %v4621_v61 = vld [vmem:[#allocation5 + $0x6c4] ss:$8 sps:$4 sm:$0xff]  }
 0x109   : > { %2770 = vmatpush1.bf16.msra.mxu1 %v4536_v62  ;;  %v4616_v62 = vld [vmem:[#allocation5 + $0x1c0] ss:$8 sps:$4 sm:$0xff]  }
 0x10a   : > { %2975 = vmatpush1.bf16.msra.mxu0 %v4537_v63  ;;  %2771 = vmatprep.subr.bf16.mxu1 %v4538_v0  ;;  %v4619_v63 = vld [vmem:[#allocation5 + $0x6c0] ss:$8 sps:$4 sm:$0xff]   ;;  %v4624_v0 = vld [vmem:[#allocation5 + $0x1d4] ss:$8 sps:$4 sm:$0xff]  }
 0x10b   : > { %2976 = vmatprep.subr.bf16.mxu0 %v4540_v1  ;;  %v4627_v1 = vld [vmem:[#allocation5 + $0x6d4] ss:$8 sps:$4 sm:$0xff]  }
 0x10d   : > { %2772 = vmatpush1.bf16.msra.mxu1 %v4542_v2  ;;  %v4622_v2 = vld [vmem:[#allocation5 + $0x1d0] ss:$8 sps:$4 sm:$0xff]  }
 0x10e   : > { %2977 = vmatpush1.bf16.msra.mxu0 %v4543_v3  ;;  %2782 = vmatprep.subr.bf16.mxu1 %v4546_v4  ;;  %v4625_v3 = vld [vmem:[#allocation5 + $0x6d0] ss:$8 sps:$4 sm:$0xff]   ;;  %v4630_v4 = vld [vmem:[#allocation5 + $0x1e4] ss:$8 sps:$4 sm:$0xff]  }
 0x10f   : > { %2987 = vmatprep.subr.bf16.mxu0 %v4549_v7  ;;  %v4631_v7 = vld [vmem:[#allocation5 + $0x6e0] ss:$8 sps:$4 sm:$0xff]  }
 0x110   : > { %2774 = vmatmul.mubr.bf16.vlgmr.msra.gmra.mrb[0].mxu1 %v401_v10  ;;  %v4634_v10 = vld [vmem:[#allocation5 + $0x1f0] ss:$8 sps:$4 sm:$0xff]  }
 0x111   : > { %2979 = vmatmul.mubr.bf16.vlgmr.msra.gmra.mrb[0].mxu0 %v411_v11  ;;  %2783 = vmatpush1.bf16.msra.mxu1 %v4544_v8  ;;  %v4636_v8 = vld [vmem:[#allocation5 + $0x1f4] ss:$8 sps:$4 sm:$0xff]   ;;  %v4637_v11 = vld [vmem:[#allocation5 + $0x6f0] ss:$8 sps:$4 sm:$0xff]  }
 0x112   : > { %2988 = vmatpush1.bf16.msra.mxu0 %v4547_v9  ;;  %2784 = vmatprep.subr.bf16.mxu1 %v4552_v12  ;;  %v4639_v9 = vld [vmem:[#allocation5 + $0x6f4] ss:$8 sps:$4 sm:$0xff]   ;;  %v4642_v12 = vld [vmem:[#allocation5 + $0x204] ss:$8 sps:$4 sm:$0xff]  }
 0x113   : > { %2989 = vmatprep.subr.bf16.mxu0 %v4555_v13  ;;  %2814 = vmatprep.mubr.bf16.mxu1 %v404_v36  ;;  %v379_v13 = vld [vmem:[%s5672_s29 + $0x10] sm:$0xff]  ;;  %v4666_v36 = vld [vmem:[#allocation5 + $0x244] ss:$8 sps:$4 sm:$0xff]  }
 0x114   : > { %3019 = vmatprep.mubr.bf16.mxu0 %v414_v41  ;;  %v4675_v41 = vld [vmem:[#allocation5 + $0x754] ss:$8 sps:$4 sm:$0xff]  }
 0x115   : > { %2785 = vmatpush1.bf16.msra.mxu1 %v4550_v14  ;;  %v389_v14 = vld [vmem:[%s5672_s29 + $0x60] sm:$0xff] }
 0x116   : > { %2990 = vmatpush1.bf16.msra.mxu0 %v4553_v15  ;;  %2786 = vmatprep.subr.bf16.mxu1 %v4558_v16  ;;  %v4645_v15 = vld [vmem:[#allocation5 + $0x704] ss:$8 sps:$4 sm:$0xff]   ;;  %v4640_v16 = vld [vmem:[#allocation5 + $0x200] ss:$8 sps:$4 sm:$0xff]  }
 0x117   : > { %2991 = vmatprep.subr.bf16.mxu0 %v4561_v17  ;;  %v4643_v17 = vld [vmem:[#allocation5 + $0x700] ss:$8 sps:$4 sm:$0xff]  }
 0x119   : > { %2787 = vmatpush1.bf16.msra.mxu1 %v4556_v18  ;;  %v403_v18 = vpack.c.bf16 %v379_v13, %v379_v13  ;;  %v4729_v13 = vld [vmem:[#allocation5 + $0x7e4] ss:$8 sps:$4 sm:$0xff]  }
 0x11a   : > { %2992 = vmatpush1.bf16.msra.mxu0 %v4559_v19  ;;  %2788 = vmatprep.subr.bf16.mxu1 %v4564_v20  ;;  %v413_v19 = vpack.c.bf16 %v389_v14, %v389_v14  ;;  %v4648_v20 = vld [vmem:[#allocation5 + $0x214] ss:$8 sps:$4 sm:$0xff]   ;;  %v4724_v14 = vld [vmem:[#allocation5 + $0x2e0] ss:$8 sps:$4 sm:$0xff]  }
 0x11b   : > { %2993 = vmatprep.subr.bf16.mxu0 %v4567_v21  ;;  %v4651_v21 = vld [vmem:[#allocation5 + $0x714] ss:$8 sps:$4 sm:$0xff]  }
 0x11d   : > { %2789 = vmatpush1.bf16.msra.mxu1 %v4562_v22  ;;  %v382_v22 = vld [vmem:[%s5672_s29 + $0x28] sm:$0xff] }
 0x11e   : > { %2994 = vmatpush1.bf16.msra.mxu0 %v4565_v23  ;;  %2790 = vmatprep.subr.bf16.mxu1 %v4570_v24  ;;  %v4646_v23 = vld [vmem:[#allocation5 + $0x210] ss:$8 sps:$4 sm:$0xff]   ;;  %v406_v24 = vpack.c.bf16 %v382_v22, %v382_v22 }
 0x11f   : > { %2995 = vmatprep.subr.bf16.mxu0 %v4573_v25  ;;  %v4649_v25 = vld [vmem:[#allocation5 + $0x710] ss:$8 sps:$4 sm:$0xff]  }
 0x120   : > { %v391_v22 = vld [vmem:[%s5672_s29 + $0x70] sm:$0xff] }
 0x121   : > { %2791 = vmatpush1.bf16.msra.mxu1 %v4568_v26  ;;  %v392_v26 = vld [vmem:[%s5672_s29 + $0x78] sm:$0xff] }
 0x122   : > { %2996 = vmatpush1.bf16.msra.mxu0 %v4571_v27  ;;  %2792 = vmatprep.subr.bf16.mxu1 %v4576_v28  ;;  %v4654_v27 = vld [vmem:[#allocation5 + $0x224] ss:$8 sps:$4 sm:$0xff]  }
 0x123   : > { %2997 = vmatprep.subr.bf16.mxu0 %v4579_v29  ;;  %v4657_v28 = vld [vmem:[#allocation5 + $0x724] ss:$8 sps:$4 sm:$0xff]   ;;  %v416_v29 = vpack.c.bf16 %v392_v26, %v392_v26 }
 0x125   : > { %2793 = vmatpush1.bf16.msra.mxu1 %v4574_v30  ;;  %v4652_v30 = vld [vmem:[#allocation5 + $0x220] ss:$8 sps:$4 sm:$0xff]  }
 0x126   : > { %2998 = vmatpush1.bf16.msra.mxu0 %v4577_v31  ;;  %2794 = vmatprep.subr.bf16.mxu1 %v4582_v32  ;;  %v4655_v31 = vld [vmem:[#allocation5 + $0x720] ss:$8 sps:$4 sm:$0xff]   ;;  %v4660_v32 = vld [vmem:[#allocation5 + $0x234] ss:$8 sps:$4 sm:$0xff]  }
 0x127   : > { %2999 = vmatprep.subr.bf16.mxu0 %v4585_v33  ;;  %v4663_v33 = vld [vmem:[#allocation5 + $0x734] ss:$8 sps:$4 sm:$0xff]  }
 0x129   : > { %2795 = vmatpush1.bf16.msra.mxu1 %v4580_v35  ;;  %v4661_v35 = vld [vmem:[#allocation5 + $0x730] ss:$8 sps:$4 sm:$0xff]  }
 0x12a   : > { %3000 = vmatpush1.bf16.msra.mxu0 %v4583_v37  ;;  %2796 = vmatprep.subr.bf16.mxu1 %v4588_v39  ;;  %v4669_v37 = vld [vmem:[#allocation5 + $0x744] ss:$8 sps:$4 sm:$0xff]   ;;  %v4667_v39 = vld [vmem:[#allocation5 + $0x740] ss:$8 sps:$4 sm:$0xff]  }
 0x12b   : > { %3001 = vmatprep.subr.bf16.mxu0 %v4591_v40  ;;  %v4672_v40 = vld [vmem:[#allocation5 + $0x254] ss:$8 sps:$4 sm:$0xff]  }
 0x12d   : > { %2797 = vmatpush1.bf16.msra.mxu1 %v4586_v42  ;;  %v4670_v42 = vld [vmem:[#allocation5 + $0x250] ss:$8 sps:$4 sm:$0xff]  }
 0x12e   : > { %3002 = vmatpush1.bf16.msra.mxu0 %v4589_v43  ;;  %2798 = vmatprep.subr.bf16.mxu1 %v4594_v44  ;;  %v4673_v43 = vld [vmem:[#allocation5 + $0x750] ss:$8 sps:$4 sm:$0xff]   ;;  %v4678_v44 = vld [vmem:[#allocation5 + $0x264] ss:$8 sps:$4 sm:$0xff]  }
 0x12f   : > { %3003 = vmatprep.subr.bf16.mxu0 %v4597_v45  ;;  %v4681_v45 = vld [vmem:[#allocation5 + $0x764] ss:$8 sps:$4 sm:$0xff]  }
 0x131   : > { %2799 = vmatpush1.bf16.msra.mxu1 %v4592_v46  ;;  %v4676_v46 = vld [vmem:[#allocation5 + $0x260] ss:$8 sps:$4 sm:$0xff]  }
 0x132   : > { %3004 = vmatpush1.bf16.msra.mxu0 %v4595_v47  ;;  %2800 = vmatprep.subr.bf16.mxu1 %v4600_v48  ;;  %v4679_v47 = vld [vmem:[#allocation5 + $0x760] ss:$8 sps:$4 sm:$0xff]   ;;  %v4684_v48 = vld [vmem:[#allocation5 + $0x274] ss:$8 sps:$4 sm:$0xff]  }
 0x133   : > { %3005 = vmatprep.subr.bf16.mxu0 %v4603_v49  ;;  %v4687_v49 = vld [vmem:[#allocation5 + $0x774] ss:$8 sps:$4 sm:$0xff]  }
 0x135   : > { %2801 = vmatpush1.bf16.msra.mxu1 %v4598_v50  ;;  %v4682_v50 = vld [vmem:[#allocation5 + $0x270] ss:$8 sps:$4 sm:$0xff]  }
 0x136   : > { %3006 = vmatpush1.bf16.msra.mxu0 %v4601_v51  ;;  %2802 = vmatprep.subr.bf16.mxu1 %v4606_v52  ;;  %v4685_v51 = vld [vmem:[#allocation5 + $0x770] ss:$8 sps:$4 sm:$0xff]   ;;  %v4690_v52 = vld [vmem:[#allocation5 + $0x284] ss:$8 sps:$4 sm:$0xff]  }
 0x137   : > { %3007 = vmatprep.subr.bf16.mxu0 %v4609_v53  ;;  %v4693_v53 = vld [vmem:[#allocation5 + $0x784] ss:$8 sps:$4 sm:$0xff]  }
 0x139   : > { %2803 = vmatpush1.bf16.msra.mxu1 %v4604_v54  ;;  %v4688_v54 = vld [vmem:[#allocation5 + $0x280] ss:$8 sps:$4 sm:$0xff]  }
 0x13a   : > { %3008 = vmatpush1.bf16.msra.mxu0 %v4607_v55  ;;  %2804 = vmatprep.subr.bf16.mxu1 %v4612_v56  ;;  %v4691_v55 = vld [vmem:[#allocation5 + $0x780] ss:$8 sps:$4 sm:$0xff]   ;;  %v4696_v56 = vld [vmem:[#allocation5 + $0x294] ss:$8 sps:$4 sm:$0xff]  }
 0x13b   : > { %3009 = vmatprep.subr.bf16.mxu0 %v4615_v57  ;;  %v4699_v57 = vld [vmem:[#allocation5 + $0x794] ss:$8 sps:$4 sm:$0xff]  }
 0x13d   : > { %2805 = vmatpush1.bf16.msra.mxu1 %v4610_v58  ;;  %v4694_v58 = vld [vmem:[#allocation5 + $0x290] ss:$8 sps:$4 sm:$0xff]  }
 0x13e   : > { %3010 = vmatpush1.bf16.msra.mxu0 %v4613_v59  ;;  %2806 = vmatprep.subr.bf16.mxu1 %v4618_v60  ;;  %v4697_v59 = vld [vmem:[#allocation5 + $0x790] ss:$8 sps:$4 sm:$0xff]   ;;  %v4702_v60 = vld [vmem:[#allocation5 + $0x2a4] ss:$8 sps:$4 sm:$0xff]  }
 0x13f   : > { %3011 = vmatprep.subr.bf16.mxu0 %v4621_v61  ;;  %v4705_v61 = vld [vmem:[#allocation5 + $0x7a4] ss:$8 sps:$4 sm:$0xff]  }
 0x141   : > { %2807 = vmatpush1.bf16.msra.mxu1 %v4616_v62  ;;  %v4700_v62 = vld [vmem:[#allocation5 + $0x2a0] ss:$8 sps:$4 sm:$0xff]  }
 0x142   : > { %3012 = vmatpush1.bf16.msra.mxu0 %v4619_v63  ;;  %2808 = vmatprep.subr.bf16.mxu1 %v4624_v0  ;;  %v4703_v63 = vld [vmem:[#allocation5 + $0x7a0] ss:$8 sps:$4 sm:$0xff]   ;;  %v4708_v0 = vld [vmem:[#allocation5 + $0x2b4] ss:$8 sps:$4 sm:$0xff]  }
 0x143   : > { %3013 = vmatprep.subr.bf16.mxu0 %v4627_v1  ;;  %v4711_v1 = vld [vmem:[#allocation5 + $0x7b4] ss:$8 sps:$4 sm:$0xff]  }
 0x145   : > { %2809 = vmatpush1.bf16.msra.mxu1 %v4622_v2  ;;  %v4706_v2 = vld [vmem:[#allocation5 + $0x2b0] ss:$8 sps:$4 sm:$0xff]  }
 0x146   : > { %3014 = vmatpush1.bf16.msra.mxu0 %v4625_v3  ;;  %2810 = vmatprep.subr.bf16.mxu1 %v4630_v4  ;;  %v4709_v3 = vld [vmem:[#allocation5 + $0x7b0] ss:$8 sps:$4 sm:$0xff]   ;;  %v4714_v4 = vld [vmem:[#allocation5 + $0x2c4] ss:$8 sps:$4 sm:$0xff]  }
 0x147   : > { %3015 = vmatprep.subr.bf16.mxu0 %v4633_v5  ;;  %v4717_v5 = vld [vmem:[#allocation5 + $0x7c4] ss:$8 sps:$4 sm:$0xff]  }
 0x149   : > { %2811 = vmatpush1.bf16.msra.mxu1 %v4628_v6  ;;  %v4712_v6 = vld [vmem:[#allocation5 + $0x2c0] ss:$8 sps:$4 sm:$0xff]  }
 0x14a   : > { %3016 = vmatpush1.bf16.msra.mxu0 %v4631_v7  ;;  %2812 = vmatprep.subr.bf16.mxu1 %v4636_v8  ;;  %v4715_v7 = vld [vmem:[#allocation5 + $0x7c0] ss:$8 sps:$4 sm:$0xff]   ;;  %v4720_v8 = vld [vmem:[#allocation5 + $0x2d4] ss:$8 sps:$4 sm:$0xff]  }
 0x14b   : > { %3017 = vmatprep.subr.bf16.mxu0 %v4639_v9  ;;  %v4723_v9 = vld [vmem:[#allocation5 + $0x7d4] ss:$8 sps:$4 sm:$0xff]  }
 0x14d   : > { %2813 = vmatpush1.bf16.msra.mxu1 %v4634_v10  ;;  %v4718_v10 = vld [vmem:[#allocation5 + $0x2d0] ss:$8 sps:$4 sm:$0xff]  }
 0x14e   : > { %3018 = vmatpush1.bf16.msra.mxu0 %v4637_v11  ;;  %2823 = vmatprep.subr.bf16.mxu1 %v4642_v12  ;;  %v4721_v11 = vld [vmem:[#allocation5 + $0x7d0] ss:$8 sps:$4 sm:$0xff]   ;;  %v4726_v12 = vld [vmem:[#allocation5 + $0x2e4] ss:$8 sps:$4 sm:$0xff]  }
 0x14f   : > { %3028 = vmatprep.subr.bf16.mxu0 %v4645_v15  ;;  %v4727_v15 = vld [vmem:[#allocation5 + $0x7e0] ss:$8 sps:$4 sm:$0xff]  }
 0x150   : > { %2815 = vmatmul.mubr.bf16.vlgmr.msra.gmra.mrb[0].mxu1 %v403_v18  ;;  %v4730_v18 = vld [vmem:[#allocation5 + $0x2f0] ss:$8 sps:$4 sm:$0xff]  }
 0x151   : > { %3020 = vmatmul.mubr.bf16.vlgmr.msra.gmra.mrb[0].mxu0 %v413_v19  ;;  %2824 = vmatpush1.bf16.msra.mxu1 %v4640_v16  ;;  %v4732_v16 = vld [vmem:[#allocation5 + $0x2f4] ss:$8 sps:$4 sm:$0xff]   ;;  %v4733_v19 = vld [vmem:[#allocation5 + $0x7f0] ss:$8 sps:$4 sm:$0xff]  }
 0x152   : > { %3029 = vmatpush1.bf16.msra.mxu0 %v4643_v17  ;;  %2825 = vmatprep.subr.bf16.mxu1 %v4648_v20  ;;  %v4735_v17 = vld [vmem:[#allocation5 + $0x7f4] ss:$8 sps:$4 sm:$0xff]   ;;  %v4738_v20 = vld [vmem:[#allocation5 + $0x304] ss:$8 sps:$4 sm:$0xff]  }
 0x153   : > { %3030 = vmatprep.subr.bf16.mxu0 %v4651_v21  ;;  %2855 = vmatprep.mubr.bf16.mxu1 %v406_v24  ;;  %v381_v21 = vld [vmem:[%s5672_s29 + $0x20] sm:$0xff] }
 0x154   : > { %3060 = vmatprep.mubr.bf16.mxu0 %v416_v29  ;;  %v4736_v24 = vld [vmem:[#allocation5 + $0x300] ss:$8 sps:$4 sm:$0xff]   ;;  %v405_v26 = vpack.c.bf16 %v381_v21, %v381_v21  ;;  %v4825_v21 = vld [vmem:[#allocation5 + $0x8e4] ss:$8 sps:$4 sm:$0xff]  }
 0x155   : > { %2826 = vmatpush1.bf16.msra.mxu1 %v4646_v23  ;;  %v4741_v23 = vld [vmem:[#allocation5 + $0x804] ss:$8 sps:$4 sm:$0xff]  }
 0x156   : > { %3031 = vmatpush1.bf16.msra.mxu0 %v4649_v25  ;;  %2827 = vmatprep.subr.bf16.mxu1 %v4654_v27  ;;  %v4739_v25 = vld [vmem:[#allocation5 + $0x800] ss:$8 sps:$4 sm:$0xff]   ;;  %v415_v27 = vpack.c.bf16 %v391_v22, %v391_v22 }
 0x157   : > { %3032 = vmatprep.subr.bf16.mxu0 %v4657_v28  ;;  %v384_v28 = vld [vmem:[%s5672_s29 + $0x38] sm:$0xff]  ;;  %v394_v29 = vld [vmem:[%s5672_s29 + $0x88] sm:$0xff] }
 0x158   : > { %v4820_v22 = vld [vmem:[#allocation5 + $0x3e0] ss:$8 sps:$4 sm:$0xff]  }
 0x159   : > { %2828 = vmatpush1.bf16.msra.mxu1 %v4652_v30  ;;  %v4744_v30 = vld [vmem:[#allocation5 + $0x314] ss:$8 sps:$4 sm:$0xff]  }
 0x15a   : > { %3033 = vmatpush1.bf16.msra.mxu0 %v4655_v31  ;;  %2829 = vmatprep.subr.bf16.mxu1 %v4660_v32  ;;  %v4747_v31 = vld [vmem:[#allocation5 + $0x814] ss:$8 sps:$4 sm:$0xff]   ;;  %v408_v32 = vpack.c.bf16 %v384_v28, %v384_v28  ;;  %v4834_v28 = vld [vmem:[#allocation5 + $0x404] ss:$8 sps:$4 sm:$0xff]  }
 0x15b   : > { %3034 = vmatprep.subr.bf16.mxu0 %v4663_v33  ;;  %v418_v33 = vpack.c.bf16 %v394_v29, %v394_v29  ;;  %v4837_v29 = vld [vmem:[#allocation5 + $0x904] ss:$8 sps:$4 sm:$0xff]  }
 0x15d   : > { %2830 = vmatpush1.bf16.msra.mxu1 %v4658_v34  ;;  %v4742_v34 = vld [vmem:[#allocation5 + $0x310] ss:$8 sps:$4 sm:$0xff]  }
 0x15e   : > { %3035 = vmatpush1.bf16.msra.mxu0 %v4661_v35  ;;  %2831 = vmatprep.subr.bf16.mxu1 %v4666_v36  ;;  %v4745_v35 = vld [vmem:[#allocation5 + $0x810] ss:$8 sps:$4 sm:$0xff]   ;;  %v4750_v36 = vld [vmem:[#allocation5 + $0x324] ss:$8 sps:$4 sm:$0xff]  }
 0x15f   : > { %3036 = vmatprep.subr.bf16.mxu0 %v4669_v37  ;;  %v4753_v37 = vld [vmem:[#allocation5 + $0x824] ss:$8 sps:$4 sm:$0xff]  }
 0x161   : > { %2832 = vmatpush1.bf16.msra.mxu1 %v4664_v38  ;;  %v4748_v38 = vld [vmem:[#allocation5 + $0x320] ss:$8 sps:$4 sm:$0xff]  }
 0x162   : > { %3037 = vmatpush1.bf16.msra.mxu0 %v4667_v39  ;;  %2833 = vmatprep.subr.bf16.mxu1 %v4672_v40  ;;  %v4751_v39 = vld [vmem:[#allocation5 + $0x820] ss:$8 sps:$4 sm:$0xff]   ;;  %v4756_v40 = vld [vmem:[#allocation5 + $0x334] ss:$8 sps:$4 sm:$0xff]  }
 0x163   : > { %3038 = vmatprep.subr.bf16.mxu0 %v4675_v41  ;;  %v4759_v41 = vld [vmem:[#allocation5 + $0x834] ss:$8 sps:$4 sm:$0xff]  }
 0x165   : > { %2834 = vmatpush1.bf16.msra.mxu1 %v4670_v42  ;;  %v4754_v42 = vld [vmem:[#allocation5 + $0x330] ss:$8 sps:$4 sm:$0xff]  }
 0x166   : > { %3039 = vmatpush1.bf16.msra.mxu0 %v4673_v43  ;;  %2835 = vmatprep.subr.bf16.mxu1 %v4678_v44  ;;  %v4757_v43 = vld [vmem:[#allocation5 + $0x830] ss:$8 sps:$4 sm:$0xff]   ;;  %v4762_v44 = vld [vmem:[#allocation5 + $0x344] ss:$8 sps:$4 sm:$0xff]  }
 0x167   : > { %3040 = vmatprep.subr.bf16.mxu0 %v4681_v45  ;;  %v4765_v45 = vld [vmem:[#allocation5 + $0x844] ss:$8 sps:$4 sm:$0xff]  }
 0x169   : > { %2836 = vmatpush1.bf16.msra.mxu1 %v4676_v46  ;;  %v4760_v46 = vld [vmem:[#allocation5 + $0x340] ss:$8 sps:$4 sm:$0xff]  }
 0x16a   : > { %3041 = vmatpush1.bf16.msra.mxu0 %v4679_v47  ;;  %2837 = vmatprep.subr.bf16.mxu1 %v4684_v48  ;;  %v4763_v47 = vld [vmem:[#allocation5 + $0x840] ss:$8 sps:$4 sm:$0xff]   ;;  %v4768_v48 = vld [vmem:[#allocation5 + $0x354] ss:$8 sps:$4 sm:$0xff]  }
 0x16b   : > { %3042 = vmatprep.subr.bf16.mxu0 %v4687_v49  ;;  %v4771_v49 = vld [vmem:[#allocation5 + $0x854] ss:$8 sps:$4 sm:$0xff]  }
 0x16d   : > { %2838 = vmatpush1.bf16.msra.mxu1 %v4682_v50  ;;  %v4766_v50 = vld [vmem:[#allocation5 + $0x350] ss:$8 sps:$4 sm:$0xff]  }
 0x16e   : > { %3043 = vmatpush1.bf16.msra.mxu0 %v4685_v51  ;;  %2839 = vmatprep.subr.bf16.mxu1 %v4690_v52  ;;  %v4769_v51 = vld [vmem:[#allocation5 + $0x850] ss:$8 sps:$4 sm:$0xff]   ;;  %v4774_v52 = vld [vmem:[#allocation5 + $0x364] ss:$8 sps:$4 sm:$0xff]  }
 0x16f   : > { %3044 = vmatprep.subr.bf16.mxu0 %v4693_v53  ;;  %v4777_v53 = vld [vmem:[#allocation5 + $0x864] ss:$8 sps:$4 sm:$0xff]  }
 0x171   : > { %2840 = vmatpush1.bf16.msra.mxu1 %v4688_v54  ;;  %v4772_v54 = vld [vmem:[#allocation5 + $0x360] ss:$8 sps:$4 sm:$0xff]  }
 0x172   : > { %3045 = vmatpush1.bf16.msra.mxu0 %v4691_v55  ;;  %2841 = vmatprep.subr.bf16.mxu1 %v4696_v56  ;;  %v4775_v55 = vld [vmem:[#allocation5 + $0x860] ss:$8 sps:$4 sm:$0xff]   ;;  %v4780_v56 = vld [vmem:[#allocation5 + $0x374] ss:$8 sps:$4 sm:$0xff]  }
 0x173   : > { %3046 = vmatprep.subr.bf16.mxu0 %v4699_v57  ;;  %v4783_v57 = vld [vmem:[#allocation5 + $0x874] ss:$8 sps:$4 sm:$0xff]  }
 0x175   : > { %2842 = vmatpush1.bf16.msra.mxu1 %v4694_v58  ;;  %v4778_v58 = vld [vmem:[#allocation5 + $0x370] ss:$8 sps:$4 sm:$0xff]  }
 0x176   : > { %3047 = vmatpush1.bf16.msra.mxu0 %v4697_v59  ;;  %2843 = vmatprep.subr.bf16.mxu1 %v4702_v60  ;;  %v4781_v59 = vld [vmem:[#allocation5 + $0x870] ss:$8 sps:$4 sm:$0xff]   ;;  %v4786_v60 = vld [vmem:[#allocation5 + $0x384] ss:$8 sps:$4 sm:$0xff]  }
 0x177   : > { %3048 = vmatprep.subr.bf16.mxu0 %v4705_v61  ;;  %v4789_v61 = vld [vmem:[#allocation5 + $0x884] ss:$8 sps:$4 sm:$0xff]  }
 0x179   : > { %2844 = vmatpush1.bf16.msra.mxu1 %v4700_v62  ;;  %v4784_v62 = vld [vmem:[#allocation5 + $0x380] ss:$8 sps:$4 sm:$0xff]  }
 0x17a   : > { %3049 = vmatpush1.bf16.msra.mxu0 %v4703_v63  ;;  %2845 = vmatprep.subr.bf16.mxu1 %v4708_v0  ;;  %v4787_v63 = vld [vmem:[#allocation5 + $0x880] ss:$8 sps:$4 sm:$0xff]   ;;  %v4792_v0 = vld [vmem:[#allocation5 + $0x394] ss:$8 sps:$4 sm:$0xff]  }
 0x17b   : > { %3050 = vmatprep.subr.bf16.mxu0 %v4711_v1  ;;  %v4795_v1 = vld [vmem:[#allocation5 + $0x894] ss:$8 sps:$4 sm:$0xff]  }
 0x17d   : > { %2846 = vmatpush1.bf16.msra.mxu1 %v4706_v2  ;;  %v4790_v2 = vld [vmem:[#allocation5 + $0x390] ss:$8 sps:$4 sm:$0xff]  }
 0x17e   : > { %3051 = vmatpush1.bf16.msra.mxu0 %v4709_v3  ;;  %2847 = vmatprep.subr.bf16.mxu1 %v4714_v4  ;;  %v4793_v3 = vld [vmem:[#allocation5 + $0x890] ss:$8 sps:$4 sm:$0xff]   ;;  %v4798_v4 = vld [vmem:[#allocation5 + $0x3a4] ss:$8 sps:$4 sm:$0xff]  }
 0x17f   : > { %3052 = vmatprep.subr.bf16.mxu0 %v4717_v5  ;;  %v4801_v5 = vld [vmem:[#allocation5 + $0x8a4] ss:$8 sps:$4 sm:$0xff]  }
 0x181   : > { %2848 = vmatpush1.bf16.msra.mxu1 %v4712_v6  ;;  %v4796_v6 = vld [vmem:[#allocation5 + $0x3a0] ss:$8 sps:$4 sm:$0xff]  }
 0x182   : > { %3053 = vmatpush1.bf16.msra.mxu0 %v4715_v7  ;;  %2849 = vmatprep.subr.bf16.mxu1 %v4720_v8  ;;  %v4799_v7 = vld [vmem:[#allocation5 + $0x8a0] ss:$8 sps:$4 sm:$0xff]   ;;  %v4804_v8 = vld [vmem:[#allocation5 + $0x3b4] ss:$8 sps:$4 sm:$0xff]  }
 0x183   : > { %3054 = vmatprep.subr.bf16.mxu0 %v4723_v9  ;;  %v4807_v9 = vld [vmem:[#allocation5 + $0x8b4] ss:$8 sps:$4 sm:$0xff]  }
 0x185   : > { %2850 = vmatpush1.bf16.msra.mxu1 %v4718_v10  ;;  %v4802_v10 = vld [vmem:[#allocation5 + $0x3b0] ss:$8 sps:$4 sm:$0xff]  }
 0x186   : > { %3055 = vmatpush1.bf16.msra.mxu0 %v4721_v11  ;;  %2851 = vmatprep.subr.bf16.mxu1 %v4726_v12  ;;  %v4805_v11 = vld [vmem:[#allocation5 + $0x8b0] ss:$8 sps:$4 sm:$0xff]   ;;  %v4810_v12 = vld [vmem:[#allocation5 + $0x3c4] ss:$8 sps:$4 sm:$0xff]  }
 0x187   : > { %3056 = vmatprep.subr.bf16.mxu0 %v4729_v13  ;;  %v4813_v13 = vld [vmem:[#allocation5 + $0x8c4] ss:$8 sps:$4 sm:$0xff]  }
 0x189   : > { %2852 = vmatpush1.bf16.msra.mxu1 %v4724_v14  ;;  %v4808_v14 = vld [vmem:[#allocation5 + $0x3c0] ss:$8 sps:$4 sm:$0xff]  }
 0x18a   : > { %3057 = vmatpush1.bf16.msra.mxu0 %v4727_v15  ;;  %2853 = vmatprep.subr.bf16.mxu1 %v4732_v16  ;;  %v4811_v15 = vld [vmem:[#allocation5 + $0x8c0] ss:$8 sps:$4 sm:$0xff]   ;;  %v4816_v16 = vld [vmem:[#allocation5 + $0x3d4] ss:$8 sps:$4 sm:$0xff]  }
 0x18b   : > { %3058 = vmatprep.subr.bf16.mxu0 %v4735_v17  ;;  %v4819_v17 = vld [vmem:[#allocation5 + $0x8d4] ss:$8 sps:$4 sm:$0xff]  }
 0x18d   : > { %2854 = vmatpush1.bf16.msra.mxu1 %v4730_v18  ;;  %v4814_v18 = vld [vmem:[#allocation5 + $0x3d0] ss:$8 sps:$4 sm:$0xff]  }
 0x18e   : > { %3059 = vmatpush1.bf16.msra.mxu0 %v4733_v19  ;;  %2864 = vmatprep.subr.bf16.mxu1 %v4738_v20  ;;  %v4817_v19 = vld [vmem:[#allocation5 + $0x8d0] ss:$8 sps:$4 sm:$0xff]   ;;  %v4822_v20 = vld [vmem:[#allocation5 + $0x3e4] ss:$8 sps:$4 sm:$0xff]  }
 0x18f   : > { %3069 = vmatprep.subr.bf16.mxu0 %v4741_v23  ;;  %v4823_v23 = vld [vmem:[#allocation5 + $0x8e0] ss:$8 sps:$4 sm:$0xff]  }
 0x190   : > { %2856 = vmatmul.mubr.bf16.vlgmr.msra.gmra.mrb[0].mxu1 %v405_v26  ;;  %v4826_v26 = vld [vmem:[#allocation5 + $0x3f0] ss:$8 sps:$4 sm:$0xff]  }
 0x191   : > { %3061 = vmatmul.mubr.bf16.vlgmr.msra.gmra.mrb[0].mxu0 %v415_v27  ;;  %2865 = vmatpush1.bf16.msra.mxu1 %v4736_v24  ;;  %v4828_v24 = vld [vmem:[#allocation5 + $0x3f4] ss:$8 sps:$4 sm:$0xff]   ;;  %v4829_v27 = vld [vmem:[#allocation5 + $0x8f0] ss:$8 sps:$4 sm:$0xff]  }
 0x192   : > { %3070 = vmatpush1.bf16.msra.mxu0 %v4739_v25  ;;  %2866 = vmatprep.subr.bf16.mxu1 %v4744_v30  ;;  %v4831_v25 = vld [vmem:[#allocation5 + $0x8f4] ss:$8 sps:$4 sm:$0xff]  }
 0x193   : > { %3071 = vmatprep.subr.bf16.mxu0 %v4747_v31  ;;  %2896 = vmatprep.mubr.bf16.mxu1 %v408_v32  ;;  %v383_v30 = vld [vmem:[%s5672_s29 + $0x30] sm:$0xff]  ;;  %v393_v31 = vld [vmem:[%s5672_s29 + $0x80] sm:$0xff]  ;;  %v386_v32 = vld [vmem:[%s5672_s29 + $0x48] sm:$0xff] }
 0x194   : > { %3101 = vmatprep.mubr.bf16.mxu0 %v418_v33  ;;  %v396_v33 = vld [vmem:[%s5672_s29 + $0x98] sm:$0xff] }
 0x195   : > { %2867 = vmatpush1.bf16.msra.mxu1 %v4742_v34  ;;  %v407_v34 = vpack.c.bf16 %v383_v30, %v383_v30  ;;  %v4916_v30 = vld [vmem:[#allocation5 + $0x4e0] ss:$8 sps:$4 sm:$0xff]  }
 0x196   : > { %3072 = vmatpush1.bf16.msra.mxu0 %v4745_v35  ;;  %2868 = vmatprep.subr.bf16.mxu1 %v4750_v36  ;;  %v417_v35 = vpack.c.bf16 %v393_v31, %v393_v31  ;;  %v4832_v36 = vld [vmem:[#allocation5 + $0x400] ss:$8 sps:$4 sm:$0xff]  }
 0x197   : > { %3073 = vmatprep.subr.bf16.mxu0 %v4753_v37  ;;  %v4835_v37 = vld [vmem:[#allocation5 + $0x900] ss:$8 sps:$4 sm:$0xff]  }
 0x198   : > { %v4919_v31 = vld [vmem:[#allocation5 + $0x9e0] ss:$8 sps:$4 sm:$0xff]  }
 0x199   : > { %2869 = vmatpush1.bf16.msra.mxu1 %v4748_v38  ;;  %v4840_v38 = vld [vmem:[#allocation5 + $0x414] ss:$8 sps:$4 sm:$0xff]  }
 0x19a   : > { %3074 = vmatpush1.bf16.msra.mxu0 %v4751_v39  ;;  %2870 = vmatprep.subr.bf16.mxu1 %v4756_v40  ;;  %v4843_v39 = vld [vmem:[#allocation5 + $0x914] ss:$8 sps:$4 sm:$0xff]   ;;  %v4838_v40 = vld [vmem:[#allocation5 + $0x410] ss:$8 sps:$4 sm:$0xff]  }
 0x19b   : > { %3075 = vmatprep.subr.bf16.mxu0 %v4759_v41  ;;  %v4841_v41 = vld [vmem:[#allocation5 + $0x910] ss:$8 sps:$4 sm:$0xff]  }
 0x19d   : > { %2871 = vmatpush1.bf16.msra.mxu1 %v4754_v42  ;;  %v410_v42 = vpack.c.bf16 %v386_v32, %v386_v32  ;;  %v4924_v32 = vld [vmem:[#allocation5 + $0x4f4] ss:$8 sps:$4 sm:$0xff]  }
 0x19e   : > { %3076 = vmatpush1.bf16.msra.mxu0 %v4757_v43  ;;  %2872 = vmatprep.subr.bf16.mxu1 %v4762_v44  ;;  %v420_v43 = vpack.c.bf16 %v396_v33, %v396_v33  ;;  %v4846_v44 = vld [vmem:[#allocation5 + $0x424] ss:$8 sps:$4 sm:$0xff]   ;;  %v4927_v33 = vld [vmem:[#allocation5 + $0x9f4] ss:$8 sps:$4 sm:$0xff]  }
 0x19f   : > { %3077 = vmatprep.subr.bf16.mxu0 %v4765_v45  ;;  %v4849_v45 = vld [vmem:[#allocation5 + $0x924] ss:$8 sps:$4 sm:$0xff]  }
 0x1a1   : > { %2873 = vmatpush1.bf16.msra.mxu1 %v4760_v46  ;;  %v4844_v46 = vld [vmem:[#allocation5 + $0x420] ss:$8 sps:$4 sm:$0xff]  }
 0x1a2   : > { %3078 = vmatpush1.bf16.msra.mxu0 %v4763_v47  ;;  %2874 = vmatprep.subr.bf16.mxu1 %v4768_v48  ;;  %v4847_v47 = vld [vmem:[#allocation5 + $0x920] ss:$8 sps:$4 sm:$0xff]   ;;  %v4852_v48 = vld [vmem:[#allocation5 + $0x434] ss:$8 sps:$4 sm:$0xff]  }
 0x1a3   : > { %3079 = vmatprep.subr.bf16.mxu0 %v4771_v49  ;;  %v4855_v49 = vld [vmem:[#allocation5 + $0x934] ss:$8 sps:$4 sm:$0xff]  }
 0x1a5   : > { %2875 = vmatpush1.bf16.msra.mxu1 %v4766_v50  ;;  %v4850_v50 = vld [vmem:[#allocation5 + $0x430] ss:$8 sps:$4 sm:$0xff]  }
 0x1a6   : > { %3080 = vmatpush1.bf16.msra.mxu0 %v4769_v51  ;;  %2876 = vmatprep.subr.bf16.mxu1 %v4774_v52  ;;  %v4853_v51 = vld [vmem:[#allocation5 + $0x930] ss:$8 sps:$4 sm:$0xff]   ;;  %v4858_v52 = vld [vmem:[#allocation5 + $0x444] ss:$8 sps:$4 sm:$0xff]  }
 0x1a7   : > { %3081 = vmatprep.subr.bf16.mxu0 %v4777_v53  ;;  %v4861_v53 = vld [vmem:[#allocation5 + $0x944] ss:$8 sps:$4 sm:$0xff]  }
 0x1a9   : > { %2877 = vmatpush1.bf16.msra.mxu1 %v4772_v54  ;;  %v4856_v54 = vld [vmem:[#allocation5 + $0x440] ss:$8 sps:$4 sm:$0xff]  }
 0x1aa   : > { %3082 = vmatpush1.bf16.msra.mxu0 %v4775_v55  ;;  %2878 = vmatprep.subr.bf16.mxu1 %v4780_v56  ;;  %v4859_v55 = vld [vmem:[#allocation5 + $0x940] ss:$8 sps:$4 sm:$0xff]   ;;  %v4864_v56 = vld [vmem:[#allocation5 + $0x454] ss:$8 sps:$4 sm:$0xff]  }
 0x1ab   : > { %3083 = vmatprep.subr.bf16.mxu0 %v4783_v57  ;;  %v4867_v57 = vld [vmem:[#allocation5 + $0x954] ss:$8 sps:$4 sm:$0xff]  }
 0x1ad   : > { %2879 = vmatpush1.bf16.msra.mxu1 %v4778_v58  ;;  %v4862_v58 = vld [vmem:[#allocation5 + $0x450] ss:$8 sps:$4 sm:$0xff]  }
 0x1ae   : > { %3084 = vmatpush1.bf16.msra.mxu0 %v4781_v59  ;;  %2880 = vmatprep.subr.bf16.mxu1 %v4786_v60  ;;  %v4865_v59 = vld [vmem:[#allocation5 + $0x950] ss:$8 sps:$4 sm:$0xff]   ;;  %v4870_v60 = vld [vmem:[#allocation5 + $0x464] ss:$8 sps:$4 sm:$0xff]  }
 0x1af   : > { %3085 = vmatprep.subr.bf16.mxu0 %v4789_v61  ;;  %v4873_v61 = vld [vmem:[#allocation5 + $0x964] ss:$8 sps:$4 sm:$0xff]  }
 0x1b1   : > { %2881 = vmatpush1.bf16.msra.mxu1 %v4784_v62  ;;  %v4868_v62 = vld [vmem:[#allocation5 + $0x460] ss:$8 sps:$4 sm:$0xff]  }
 0x1b2   : > { %3086 = vmatpush1.bf16.msra.mxu0 %v4787_v63  ;;  %2882 = vmatprep.subr.bf16.mxu1 %v4792_v0  ;;  %v4871_v63 = vld [vmem:[#allocation5 + $0x960] ss:$8 sps:$4 sm:$0xff]   ;;  %v4876_v0 = vld [vmem:[#allocation5 + $0x474] ss:$8 sps:$4 sm:$0xff]  }
 0x1b3   : > { %3087 = vmatprep.subr.bf16.mxu0 %v4795_v1  ;;  %v4879_v1 = vld [vmem:[#allocation5 + $0x974] ss:$8 sps:$4 sm:$0xff]  }
 0x1b5   : > { %2883 = vmatpush1.bf16.msra.mxu1 %v4790_v2  ;;  %v4874_v2 = vld [vmem:[#allocation5 + $0x470] ss:$8 sps:$4 sm:$0xff]  }
 0x1b6   : > { %3088 = vmatpush1.bf16.msra.mxu0 %v4793_v3  ;;  %2884 = vmatprep.subr.bf16.mxu1 %v4798_v4  ;;  %v4877_v3 = vld [vmem:[#allocation5 + $0x970] ss:$8 sps:$4 sm:$0xff]   ;;  %v4882_v4 = vld [vmem:[#allocation5 + $0x484] ss:$8 sps:$4 sm:$0xff]  }
 0x1b7   : > { %3089 = vmatprep.subr.bf16.mxu0 %v4801_v5  ;;  %v4885_v5 = vld [vmem:[#allocation5 + $0x984] ss:$8 sps:$4 sm:$0xff]  }
 0x1b9   : > { %2885 = vmatpush1.bf16.msra.mxu1 %v4796_v6  ;;  %v4880_v6 = vld [vmem:[#allocation5 + $0x480] ss:$8 sps:$4 sm:$0xff]  }
 0x1ba   : > { %3090 = vmatpush1.bf16.msra.mxu0 %v4799_v7  ;;  %2886 = vmatprep.subr.bf16.mxu1 %v4804_v8  ;;  %v4883_v7 = vld [vmem:[#allocation5 + $0x980] ss:$8 sps:$4 sm:$0xff]   ;;  %v4888_v8 = vld [vmem:[#allocation5 + $0x494] ss:$8 sps:$4 sm:$0xff]  }
 0x1bb   : > { %3091 = vmatprep.subr.bf16.mxu0 %v4807_v9  ;;  %v4891_v9 = vld [vmem:[#allocation5 + $0x994] ss:$8 sps:$4 sm:$0xff]  }
 0x1bd   : > { %2887 = vmatpush1.bf16.msra.mxu1 %v4802_v10  ;;  %v4886_v10 = vld [vmem:[#allocation5 + $0x490] ss:$8 sps:$4 sm:$0xff]  }
 0x1be   : > { %3092 = vmatpush1.bf16.msra.mxu0 %v4805_v11  ;;  %2888 = vmatprep.subr.bf16.mxu1 %v4810_v12  ;;  %v4889_v11 = vld [vmem:[#allocation5 + $0x990] ss:$8 sps:$4 sm:$0xff]   ;;  %v4894_v12 = vld [vmem:[#allocation5 + $0x4a4] ss:$8 sps:$4 sm:$0xff]  }
 0x1bf   : > { %3093 = vmatprep.subr.bf16.mxu0 %v4813_v13  ;;  %v4897_v13 = vld [vmem:[#allocation5 + $0x9a4] ss:$8 sps:$4 sm:$0xff]  }
 0x1c1   : > { %2889 = vmatpush1.bf16.msra.mxu1 %v4808_v14  ;;  %v4892_v14 = vld [vmem:[#allocation5 + $0x4a0] ss:$8 sps:$4 sm:$0xff]  }
 0x1c2   : > { %3094 = vmatpush1.bf16.msra.mxu0 %v4811_v15  ;;  %2890 = vmatprep.subr.bf16.mxu1 %v4816_v16  ;;  %v4895_v15 = vld [vmem:[#allocation5 + $0x9a0] ss:$8 sps:$4 sm:$0xff]   ;;  %v4900_v16 = vld [vmem:[#allocation5 + $0x4b4] ss:$8 sps:$4 sm:$0xff]  }
 0x1c3   : > { %3095 = vmatprep.subr.bf16.mxu0 %v4819_v17  ;;  %v4903_v17 = vld [vmem:[#allocation5 + $0x9b4] ss:$8 sps:$4 sm:$0xff]  }
 0x1c5   : > { %2891 = vmatpush1.bf16.msra.mxu1 %v4814_v18  ;;  %v4898_v18 = vld [vmem:[#allocation5 + $0x4b0] ss:$8 sps:$4 sm:$0xff]  }
 0x1c6   : > { %3096 = vmatpush1.bf16.msra.mxu0 %v4817_v19  ;;  %2892 = vmatprep.subr.bf16.mxu1 %v4822_v20  ;;  %v4901_v19 = vld [vmem:[#allocation5 + $0x9b0] ss:$8 sps:$4 sm:$0xff]   ;;  %v4906_v20 = vld [vmem:[#allocation5 + $0x4c4] ss:$8 sps:$4 sm:$0xff]  }
 0x1c7   : > { %3097 = vmatprep.subr.bf16.mxu0 %v4825_v21  ;;  %v4909_v21 = vld [vmem:[#allocation5 + $0x9c4] ss:$8 sps:$4 sm:$0xff]  }
 0x1c9   : > { %2893 = vmatpush1.bf16.msra.mxu1 %v4820_v22  ;;  %v4904_v22 = vld [vmem:[#allocation5 + $0x4c0] ss:$8 sps:$4 sm:$0xff]  }
 0x1ca   : > { %3098 = vmatpush1.bf16.msra.mxu0 %v4823_v23  ;;  %2894 = vmatprep.subr.bf16.mxu1 %v4828_v24  ;;  %v4907_v23 = vld [vmem:[#allocation5 + $0x9c0] ss:$8 sps:$4 sm:$0xff]   ;;  %v4912_v24 = vld [vmem:[#allocation5 + $0x4d4] ss:$8 sps:$4 sm:$0xff]  }
 0x1cb   : > { %3099 = vmatprep.subr.bf16.mxu0 %v4831_v25  ;;  %v4915_v25 = vld [vmem:[#allocation5 + $0x9d4] ss:$8 sps:$4 sm:$0xff]  }
 0x1cd   : > { %2895 = vmatpush1.bf16.msra.mxu1 %v4826_v26  ;;  %v4910_v26 = vld [vmem:[#allocation5 + $0x4d0] ss:$8 sps:$4 sm:$0xff]  }
 0x1ce   : > { %3100 = vmatpush1.bf16.msra.mxu0 %v4829_v27  ;;  %2905 = vmatprep.subr.bf16.mxu1 %v4834_v28  ;;  %v4913_v27 = vld [vmem:[#allocation5 + $0x9d0] ss:$8 sps:$4 sm:$0xff]   ;;  %v4918_v28 = vld [vmem:[#allocation5 + $0x4e4] ss:$8 sps:$4 sm:$0xff]  }
 0x1cf   : > { %3110 = vmatprep.subr.bf16.mxu0 %v4837_v29  ;;  %v4921_v29 = vld [vmem:[#allocation5 + $0x9e4] ss:$8 sps:$4 sm:$0xff]  }
 0x1d0   : > { %2897 = vmatmul.mubr.bf16.vlgmr.msra.gmra.mrb[0].mxu1 %v407_v34  ;;  %v4922_v34 = vld [vmem:[#allocation5 + $0x4f0] ss:$8 sps:$4 sm:$0xff]  }
 0x1d1   : > { %3102 = vmatmul.mubr.bf16.vlgmr.msra.gmra.mrb[0].mxu0 %v417_v35  ;;  %2906 = vmatpush1.bf16.msra.mxu1 %v4832_v36  ;;  %v4925_v35 = vld [vmem:[#allocation5 + $0x9f0] ss:$8 sps:$4 sm:$0xff]   ;;  %v385_v36 = vld [vmem:[%s5672_s29 + $0x40] sm:$0xff] }
 0x1d2   : > { %3111 = vmatpush1.bf16.msra.mxu0 %v4835_v37  ;;  %2907 = vmatprep.subr.bf16.mxu1 %v4840_v38  ;;  %v395_v37 = vld [vmem:[%s5672_s29 + $0x90] sm:$0xff]  ;;  %v4930_v38 = vld [vmem:[#allocation5 + $0xa04] ss:$8 sps:$4 sm:$0xff]  }
 0x1d3   : > { %3112 = vmatprep.subr.bf16.mxu0 %v4843_v39  ;;  %2937 = vmatprep.mubr.bf16.mxu1 %v410_v42  ;;  %v398_v39 = vld [vmem:[%s5672_s29 + $0xa8] sm:$0xff] }
 0x1d4   : > { %3142 = vmatprep.mubr.bf16.mxu0 %v420_v43  ;;  %v4928_v42 = vld [vmem:[#allocation5 + $0xa00] ss:$8 sps:$4 sm:$0xff]   ;;  %v422_v43 = vpack.c.bf16 %v398_v39, %v398_v39 }
 0x1d5   : > { %2908 = vmatpush1.bf16.msra.mxu1 %v4838_v40  ;;  %v409_v40 = vpack.c.bf16 %v385_v36, %v385_v36  ;;  %v5000_v36 = vld [vmem:[#allocation5 + $0xb80] ss:$8 sps:$4 sm:$0xff]  }
 0x1d6   : > { %3113 = vmatpush1.bf16.msra.mxu0 %v4841_v41  ;;  %2909 = vmatprep.subr.bf16.mxu1 %v4846_v44  ;;  %v419_v41 = vpack.c.bf16 %v395_v37, %v395_v37  ;;  %v4933_v44 = vld [vmem:[#allocation5 + $0xa14] ss:$8 sps:$4 sm:$0xff]   ;;  %v5030_v37 = vld [vmem:[#allocation8 + $0x20] ss:$8 sps:$4 sm:$0xff]  }
 0x1d7   : > { %3114 = vmatprep.subr.bf16.mxu0 %v4849_v45  ;;  %v4931_v45 = vld [vmem:[#allocation5 + $0xa10] ss:$8 sps:$4 sm:$0xff]  }
 0x1d8   : > { %v5035_v39 = vld [vmem:[#allocation8 + $0x34] ss:$8 sps:$4 sm:$0xff]  }
 0x1d9   : > { %2910 = vmatpush1.bf16.msra.mxu1 %v4844_v46  ;;  %v4936_v46 = vld [vmem:[#allocation5 + $0xa24] ss:$8 sps:$4 sm:$0xff]  }
 0x1da   : > { %3115 = vmatpush1.bf16.msra.mxu0 %v4847_v47  ;;  %2911 = vmatprep.subr.bf16.mxu1 %v4852_v48  ;;  %v4934_v47 = vld [vmem:[#allocation5 + $0xa20] ss:$8 sps:$4 sm:$0xff]   ;;  %v4939_v48 = vld [vmem:[#allocation5 + $0xa34] ss:$8 sps:$4 sm:$0xff]  }
 0x1db   : > { %3116 = vmatprep.subr.bf16.mxu0 %v4855_v49  ;;  %v4937_v49 = vld [vmem:[#allocation5 + $0xa30] ss:$8 sps:$4 sm:$0xff]  }
 0x1dd   : > { %2912 = vmatpush1.bf16.msra.mxu1 %v4850_v50  ;;  %v4942_v50 = vld [vmem:[#allocation5 + $0xa44] ss:$8 sps:$4 sm:$0xff]  }
 0x1de   : > { %3117 = vmatpush1.bf16.msra.mxu0 %v4853_v51  ;;  %2913 = vmatprep.subr.bf16.mxu1 %v4858_v52  ;;  %v4940_v51 = vld [vmem:[#allocation5 + $0xa40] ss:$8 sps:$4 sm:$0xff]   ;;  %v4945_v52 = vld [vmem:[#allocation5 + $0xa54] ss:$8 sps:$4 sm:$0xff]  }
 0x1df   : > { %3118 = vmatprep.subr.bf16.mxu0 %v4861_v53  ;;  %v4943_v53 = vld [vmem:[#allocation5 + $0xa50] ss:$8 sps:$4 sm:$0xff]  }
 0x1e1   : > { %2914 = vmatpush1.bf16.msra.mxu1 %v4856_v54  ;;  %v4948_v54 = vld [vmem:[#allocation5 + $0xa64] ss:$8 sps:$4 sm:$0xff]  }
 0x1e2   : > { %3119 = vmatpush1.bf16.msra.mxu0 %v4859_v55  ;;  %2915 = vmatprep.subr.bf16.mxu1 %v4864_v56  ;;  %v4946_v55 = vld [vmem:[#allocation5 + $0xa60] ss:$8 sps:$4 sm:$0xff]   ;;  %v4951_v56 = vld [vmem:[#allocation5 + $0xa74] ss:$8 sps:$4 sm:$0xff]  }
 0x1e3   : > { %3120 = vmatprep.subr.bf16.mxu0 %v4867_v57  ;;  %v4949_v57 = vld [vmem:[#allocation5 + $0xa70] ss:$8 sps:$4 sm:$0xff]  }
 0x1e5   : > { %2916 = vmatpush1.bf16.msra.mxu1 %v4862_v58  ;;  %v4954_v58 = vld [vmem:[#allocation5 + $0xa84] ss:$8 sps:$4 sm:$0xff]  }
 0x1e6   : > { %3121 = vmatpush1.bf16.msra.mxu0 %v4865_v59  ;;  %2917 = vmatprep.subr.bf16.mxu1 %v4870_v60  ;;  %v4952_v59 = vld [vmem:[#allocation5 + $0xa80] ss:$8 sps:$4 sm:$0xff]   ;;  %v4957_v60 = vld [vmem:[#allocation5 + $0xa94] ss:$8 sps:$4 sm:$0xff]  }
 0x1e7   : > { %3122 = vmatprep.subr.bf16.mxu0 %v4873_v61  ;;  %v4955_v61 = vld [vmem:[#allocation5 + $0xa90] ss:$8 sps:$4 sm:$0xff]  }
 0x1e9   : > { %2918 = vmatpush1.bf16.msra.mxu1 %v4868_v62  ;;  %v4960_v62 = vld [vmem:[#allocation5 + $0xaa4] ss:$8 sps:$4 sm:$0xff]  }
 0x1ea   : > { %3123 = vmatpush1.bf16.msra.mxu0 %v4871_v63  ;;  %2919 = vmatprep.subr.bf16.mxu1 %v4876_v0  ;;  %v4958_v63 = vld [vmem:[#allocation5 + $0xaa0] ss:$8 sps:$4 sm:$0xff]   ;;  %v4963_v0 = vld [vmem:[#allocation5 + $0xab4] ss:$8 sps:$4 sm:$0xff]  }
 0x1eb   : > { %3124 = vmatprep.subr.bf16.mxu0 %v4879_v1  ;;  %v4961_v1 = vld [vmem:[#allocation5 + $0xab0] ss:$8 sps:$4 sm:$0xff]  }
 0x1ed   : > { %2920 = vmatpush1.bf16.msra.mxu1 %v4874_v2  ;;  %v4966_v2 = vld [vmem:[#allocation5 + $0xac4] ss:$8 sps:$4 sm:$0xff]  }
 0x1ee   : > { %3125 = vmatpush1.bf16.msra.mxu0 %v4877_v3  ;;  %2921 = vmatprep.subr.bf16.mxu1 %v4882_v4  ;;  %v4964_v3 = vld [vmem:[#allocation5 + $0xac0] ss:$8 sps:$4 sm:$0xff]   ;;  %v4969_v4 = vld [vmem:[#allocation5 + $0xad4] ss:$8 sps:$4 sm:$0xff]  }
 0x1ef   : > { %3126 = vmatprep.subr.bf16.mxu0 %v4885_v5  ;;  %v4967_v5 = vld [vmem:[#allocation5 + $0xad0] ss:$8 sps:$4 sm:$0xff]  }
 0x1f1   : > { %2922 = vmatpush1.bf16.msra.mxu1 %v4880_v6  ;;  %v4972_v6 = vld [vmem:[#allocation5 + $0xae4] ss:$8 sps:$4 sm:$0xff]  }
 0x1f2   : > { %3127 = vmatpush1.bf16.msra.mxu0 %v4883_v7  ;;  %2923 = vmatprep.subr.bf16.mxu1 %v4888_v8  ;;  %v4970_v7 = vld [vmem:[#allocation5 + $0xae0] ss:$8 sps:$4 sm:$0xff]   ;;  %v4975_v8 = vld [vmem:[#allocation5 + $0xaf4] ss:$8 sps:$4 sm:$0xff]  }
 0x1f3   : > { %3128 = vmatprep.subr.bf16.mxu0 %v4891_v9  ;;  %v4973_v9 = vld [vmem:[#allocation5 + $0xaf0] ss:$8 sps:$4 sm:$0xff]  }
 0x1f5   : > { %2924 = vmatpush1.bf16.msra.mxu1 %v4886_v10  ;;  %v397_v10 = vld [vmem:[%s5672_s29 + $0xa0] sm:$0xff] }
 0x1f6   : > { %3129 = vmatpush1.bf16.msra.mxu0 %v4889_v11  ;;  %2925 = vmatprep.subr.bf16.mxu1 %v4894_v12  ;;  %v4978_v11 = vld [vmem:[#allocation5 + $0xb04] ss:$8 sps:$4 sm:$0xff]   ;;  %v400_v12 = vld [vmem:[%s5672_s29 + $0xb8] sm:$0xff] }
 0x1f7   : > { %3130 = vmatprep.subr.bf16.mxu0 %v4897_v13  ;;  %v421_v13 = vpack.c.bf16 %v397_v10, %v397_v10  ;;  %v5065_v10 = vld [vmem:[#allocation8 + $0xd4] ss:$8 sps:$4 sm:$0xff]  }
 0x1f9   : > { %2926 = vmatpush1.bf16.msra.mxu1 %v4892_v14  ;;  %v4976_v14 = vld [vmem:[#allocation5 + $0xb00] ss:$8 sps:$4 sm:$0xff]  }
 0x1fa   : > { %3131 = vmatpush1.bf16.msra.mxu0 %v4895_v15  ;;  %2927 = vmatprep.subr.bf16.mxu1 %v4900_v16  ;;  %v424_v15 = vpack.c.bf16 %v400_v12, %v400_v12  ;;  %v4981_v16 = vld [vmem:[#allocation5 + $0xb14] ss:$8 sps:$4 sm:$0xff]   ;;  %v5068_v12 = vld [vmem:[#allocation8 + $0xe4] ss:$8 sps:$4 sm:$0xff]  }
 0x1fb   : > { %3132 = vmatprep.subr.bf16.mxu0 %v4903_v17  ;;  %v4979_v17 = vld [vmem:[#allocation5 + $0xb10] ss:$8 sps:$4 sm:$0xff]  }
 0x1fd   : > { %2928 = vmatpush1.bf16.msra.mxu1 %v4898_v18  ;;  %v4984_v18 = vld [vmem:[#allocation5 + $0xb24] ss:$8 sps:$4 sm:$0xff]  }
 0x1fe   : > { %3133 = vmatpush1.bf16.msra.mxu0 %v4901_v19  ;;  %2929 = vmatprep.subr.bf16.mxu1 %v4906_v20  ;;  %v4982_v19 = vld [vmem:[#allocation5 + $0xb20] ss:$8 sps:$4 sm:$0xff]   ;;  %v4987_v20 = vld [vmem:[#allocation5 + $0xb34] ss:$8 sps:$4 sm:$0xff]  }
 0x1ff   : > { %3134 = vmatprep.subr.bf16.mxu0 %v4909_v21  ;;  %v4985_v21 = vld [vmem:[#allocation5 + $0xb30] ss:$8 sps:$4 sm:$0xff]  }
 0x201   : > { %2930 = vmatpush1.bf16.msra.mxu1 %v4904_v22  ;;  %v4990_v22 = vld [vmem:[#allocation5 + $0xb44] ss:$8 sps:$4 sm:$0xff]  }
 0x202   : > { %3135 = vmatpush1.bf16.msra.mxu0 %v4907_v23  ;;  %2931 = vmatprep.subr.bf16.mxu1 %v4912_v24  ;;  %v4988_v23 = vld [vmem:[#allocation5 + $0xb40] ss:$8 sps:$4 sm:$0xff]   ;;  %v4993_v24 = vld [vmem:[#allocation5 + $0xb54] ss:$8 sps:$4 sm:$0xff]  }
 0x203   : > { %3136 = vmatprep.subr.bf16.mxu0 %v4915_v25  ;;  %v4991_v25 = vld [vmem:[#allocation5 + $0xb50] ss:$8 sps:$4 sm:$0xff]  }
 0x205   : > { %2932 = vmatpush1.bf16.msra.mxu1 %v4910_v26  ;;  %v4996_v26 = vld [vmem:[#allocation5 + $0xb64] ss:$8 sps:$4 sm:$0xff]  }
 0x206   : > { %3137 = vmatpush1.bf16.msra.mxu0 %v4913_v27  ;;  %2933 = vmatprep.subr.bf16.mxu1 %v4918_v28  ;;  %v4994_v27 = vld [vmem:[#allocation5 + $0xb60] ss:$8 sps:$4 sm:$0xff]   ;;  %v4999_v28 = vld [vmem:[#allocation5 + $0xb74] ss:$8 sps:$4 sm:$0xff]  }
 0x207   : > { %3138 = vmatprep.subr.bf16.mxu0 %v4921_v29  ;;  %v5024_v29 = vld [vmem:[#allocation8] ss:$8 sps:$4 sm:$0xff]  }
 0x209   : > { %2934 = vmatpush1.bf16.msra.mxu1 %v4916_v30  ;;  %v5026_v30 = vld [vmem:[#allocation8 + $0x4] ss:$8 sps:$4 sm:$0xff]  }
 0x20a   : > { %3139 = vmatpush1.bf16.msra.mxu0 %v4919_v31  ;;  %2935 = vmatprep.subr.bf16.mxu1 %v4924_v32  ;;  %v5029_v31 = vld [vmem:[#allocation8 + $0x14] ss:$8 sps:$4 sm:$0xff]  }
 0x20b   : > { %3140 = vmatprep.subr.bf16.mxu0 %v4927_v33  ;;  %v4997_v32 = vld [vmem:[#allocation5 + $0xb70] ss:$8 sps:$4 sm:$0xff]  }
 0x20c   : > { %v5027_v33 = vld [vmem:[#allocation8 + $0x10] ss:$8 sps:$4 sm:$0xff]  }
 0x20d   : > { %2936 = vmatpush1.bf16.msra.mxu1 %v4922_v34  ;;  %v5002_v34 = vld [vmem:[#allocation5 + $0xb84] ss:$8 sps:$4 sm:$0xff]  }
 0x20e   : > { %3141 = vmatpush1.bf16.msra.mxu0 %v4925_v35  ;;  %3441 = vmatprep.subr.bf16.mxu1 %v5026_v30  ;;  %v5032_v35 = vld [vmem:[#allocation8 + $0x24] ss:$8 sps:$4 sm:$0xff]  }
 0x20f   : > { %3151 = vmatprep.subr.bf16.mxu0 %v4930_v38  ;;  %v5005_v38 = vld [vmem:[#allocation5 + $0xb94] ss:$8 sps:$4 sm:$0xff]  }
 0x210   : > { %2938 = vmatmul.mubr.bf16.vlgmr.msra.gmra.mrb[0].mxu1 %v409_v40  ;;  %v5003_v40 = vld [vmem:[#allocation5 + $0xb90] ss:$8 sps:$4 sm:$0xff]  }
 0x211   : > { %3143 = vmatmul.mubr.bf16.vlgmr.msra.gmra.mrb[0].mxu0 %v419_v41  ;;  %3442 = vmatpush1.bf16.msra.mxu1 %v5024_v29  ;;  %v5033_v41 = vld [vmem:[#allocation8 + $0x30] ss:$8 sps:$4 sm:$0xff]  }
 0x212   : > { %3152 = vmatpush1.bf16.msra.mxu0 %v4928_v42  ;;  %3183 = vmatprep.mubr.bf16.mxu0 %v422_v43  ;;  %v5008_v42 = vld [vmem:[#allocation5 + $0xba4] ss:$8 sps:$4 sm:$0xff]  }
 0x213   : > { %3153 = vmatprep.subr.bf16.mxu0 %v4933_v44  ;;  %3443 = vmatprep.subr.bf16.mxu1 %v5029_v31  ;;  %v5038_v43 = vld [vmem:[#allocation8 + $0x44] ss:$8 sps:$4 sm:$0xff]  }
 0x214   : > { %v5006_v44 = vld [vmem:[#allocation5 + $0xba0] ss:$8 sps:$4 sm:$0xff]  }
 0x215   : > { %3444 = vmatpush1.bf16.msra.mxu1 %v5027_v33 }
 0x216   : > { %3154 = vmatpush1.bf16.msra.mxu0 %v4931_v45  ;;  %3445 = vmatprep.subr.bf16.mxu1 %v5032_v35  ;;  %v5036_v45 = vld [vmem:[#allocation8 + $0x40] ss:$8 sps:$4 sm:$0xff]  }
 0x217   : > { %3155 = vmatprep.subr.bf16.mxu0 %v4936_v46  ;;  %v5011_v46 = vld [vmem:[#allocation5 + $0xbb4] ss:$8 sps:$4 sm:$0xff]  }
 0x219   : > { %3446 = vmatpush1.bf16.msra.mxu1 %v5030_v37 }
 0x21a   : > { %3156 = vmatpush1.bf16.msra.mxu0 %v4934_v47  ;;  %3447 = vmatprep.subr.bf16.mxu1 %v5035_v39  ;;  %v5041_v47 = vld [vmem:[#allocation8 + $0x54] ss:$8 sps:$4 sm:$0xff]   ;;  %v5073_v39 = vld [vmem:[#allocation11] sm:$0xff]  }
 0x21b   : > { %3157 = vmatprep.subr.bf16.mxu0 %v4939_v48  ;;  %v5009_v48 = vld [vmem:[#allocation5 + $0xbb0] ss:$8 sps:$4 sm:$0xff]  }
 0x21d   : > { %3448 = vmatpush1.bf16.msra.mxu1 %v5033_v41  ;;  %v5074_v41 = vld [vmem:[#allocation11 + $0x48] sm:$0xff]  }
 0x21e   : > { %3158 = vmatpush1.bf16.msra.mxu0 %v4937_v49  ;;  %3449 = vmatprep.subr.bf16.mxu1 %v5038_v43  ;;  %v5039_v49 = vld [vmem:[#allocation8 + $0x50] ss:$8 sps:$4 sm:$0xff]  }
 0x21f   : > { %3159 = vmatprep.subr.bf16.mxu0 %v4942_v50  ;;  %v5014_v50 = vld [vmem:[#allocation5 + $0xbc4] ss:$8 sps:$4 sm:$0xff]   ;;  %v5076_v43 = vld [vmem:[#allocation11 + $0x50] sm:$0xff]  }
 0x221   : > { %3450 = vmatpush1.bf16.msra.mxu1 %v5036_v45  ;;  %v5078_v45 = vld [vmem:[#allocation11 + $0x58] sm:$0xff]  }
 0x222   : > { %3160 = vmatpush1.bf16.msra.mxu0 %v4940_v51  ;;  %3451 = vmatprep.subr.bf16.mxu1 %v5041_v47  ;;  %v5044_v51 = vld [vmem:[#allocation8 + $0x64] ss:$8 sps:$4 sm:$0xff]  }
 0x223   : > { %3161 = vmatprep.subr.bf16.mxu0 %v4945_v52  ;;  %v5012_v52 = vld [vmem:[#allocation5 + $0xbc0] ss:$8 sps:$4 sm:$0xff]  }
 0x224   : > { %v5080_v47 = vld [vmem:[#allocation11 + $0x60] sm:$0xff]  }
 0x225   : > { %3452 = vmatpush1.bf16.msra.mxu1 %v5039_v49  ;;  %v5082_v49 = vld [vmem:[#allocation11 + $0x68] sm:$0xff]  }
 0x226   : > { %3162 = vmatpush1.bf16.msra.mxu0 %v4943_v53  ;;  %v5042_v53 = vld [vmem:[#allocation8 + $0x60] ss:$8 sps:$4 sm:$0xff]   ;;  %3453 = vmatprep.subr.bf16.mxu1 %v5044_v51  ;;  %v5084_v51 = vld [vmem:[#allocation11 + $0x70] sm:$0xff]  }
 0x227   : > { %3163 = vmatprep.subr.bf16.mxu0 %v4948_v54  ;;  %v5017_v54 = vld [vmem:[#allocation5 + $0xbd4] ss:$8 sps:$4 sm:$0xff]  }
 0x229   : > { %3454 = vmatpush1.bf16.msra.mxu1 %v5042_v53  ;;  %v5086_v53 = vld [vmem:[#allocation11 + $0x78] sm:$0xff]  }
 0x22a   : > { %3164 = vmatpush1.bf16.msra.mxu0 %v4946_v55  ;;  %v5047_v55 = vld [vmem:[#allocation8 + $0x74] ss:$8 sps:$4 sm:$0xff]  }
 0x22b   : > { %3165 = vmatprep.subr.bf16.mxu0 %v4951_v56  ;;  %v5015_v56 = vld [vmem:[#allocation5 + $0xbd0] ss:$8 sps:$4 sm:$0xff]   ;;  %3455 = vmatprep.subr.bf16.mxu1 %v5047_v55  ;;  %v3269_v55 = vld [vmem:[#allocation10] sm:$0x3] }
 0x22e   : > { %3166 = vmatpush1.bf16.msra.mxu0 %v4949_v57  ;;  %v5045_v57 = vld [vmem:[#allocation8 + $0x70] ss:$8 sps:$4 sm:$0xff]  }
 0x22f   : > { %3167 = vmatprep.subr.bf16.mxu0 %v4954_v58  ;;  %v5020_v58 = vld [vmem:[#allocation5 + $0xbe4] ss:$8 sps:$4 sm:$0xff]   ;;  %3456 = vmatpush1.bf16.msra.mxu1 %v5045_v57 }
 0x232   : > { %3168 = vmatpush1.bf16.msra.mxu0 %v4952_v59  ;;  %v5050_v59 = vld [vmem:[#allocation8 + $0x84] ss:$8 sps:$4 sm:$0xff]  }
 0x233   : > { %3169 = vmatprep.subr.bf16.mxu0 %v4957_v60  ;;  %v5018_v60 = vld [vmem:[#allocation5 + $0xbe0] ss:$8 sps:$4 sm:$0xff]   ;;  %3457 = vmatprep.subr.bf16.mxu1 %v5050_v59 }
 0x236   : > { %3170 = vmatpush1.bf16.msra.mxu0 %v4955_v61  ;;  %v5048_v61 = vld [vmem:[#allocation8 + $0x80] ss:$8 sps:$4 sm:$0xff]  }
 0x237   : > { %3171 = vmatprep.subr.bf16.mxu0 %v4960_v62  ;;  %v5023_v62 = vld [vmem:[#allocation5 + $0xbf4] ss:$8 sps:$4 sm:$0xff]   ;;  %3458 = vmatpush1.bf16.msra.mxu1 %v5048_v61 }
 0x23a   : > { %3172 = vmatpush1.bf16.msra.mxu0 %v4958_v63  ;;  %v5053_v63 = vld [vmem:[#allocation8 + $0x94] ss:$8 sps:$4 sm:$0xff]  }
 0x23b   : > { %3173 = vmatprep.subr.bf16.mxu0 %v4963_v0  ;;  %v5021_v0 = vld [vmem:[#allocation5 + $0xbf0] ss:$8 sps:$4 sm:$0xff]   ;;  %3459 = vmatprep.subr.bf16.mxu1 %v5053_v63 }
 0x23e   : > { %3174 = vmatpush1.bf16.msra.mxu0 %v4961_v1  ;;  %v399_v1 = vld [vmem:[%s5672_s29 + $0xb0] sm:$0xff] }
 0x23f   : > { %3175 = vmatprep.subr.bf16.mxu0 %v4966_v2  ;;  %v5051_v2 = vld [vmem:[#allocation8 + $0x90] ss:$8 sps:$4 sm:$0xff]  }
 0x240   : > { %3460 = vmatpush1.bf16.msra.mxu1 %v5051_v2 }
 0x242   : > { %3176 = vmatpush1.bf16.msra.mxu0 %v4964_v3  ;;  %v5056_v3 = vld [vmem:[#allocation8 + $0xa4] ss:$8 sps:$4 sm:$0xff]  }
 0x243   : > { %3177 = vmatprep.subr.bf16.mxu0 %v4969_v4  ;;  %v423_v4 = vpack.c.bf16 %v399_v1, %v399_v1  ;;  %3461 = vmatprep.subr.bf16.mxu1 %v5056_v3 }
 0x246   : > { %3178 = vmatpush1.bf16.msra.mxu0 %v4967_v5  ;;  %v5054_v5 = vld [vmem:[#allocation8 + $0xa0] ss:$8 sps:$4 sm:$0xff]  }
 0x247   : > { %3179 = vmatprep.subr.bf16.mxu0 %v4972_v6  ;;  %v5059_v6 = vld [vmem:[#allocation8 + $0xb4] ss:$8 sps:$4 sm:$0xff]   ;;  %3462 = vmatpush1.bf16.msra.mxu1 %v5054_v5 }
 0x248   : > { %3463 = vmatprep.subr.bf16.mxu1 %v5059_v6  ;;  %v4247_v6 = vld [vmem:[#allocation13] ss:$0 sm:$0xff] }
 0x24a   : > { %3180 = vmatpush1.bf16.msra.mxu0 %v4970_v7  ;;  %v5057_v7 = vld [vmem:[#allocation8 + $0xb0] ss:$8 sps:$4 sm:$0xff]  }
 0x24b   : > { %3181 = vmatprep.subr.bf16.mxu0 %v4975_v8  ;;  %v5062_v8 = vld [vmem:[#allocation8 + $0xc4] ss:$8 sps:$4 sm:$0xff]   ;;  %3464 = vmatpush1.bf16.msra.mxu1 %v5057_v7 }
 0x24c   : > { %3465 = vmatprep.subr.bf16.mxu1 %v5062_v8 }
 0x24e   : > { %3182 = vmatpush1.bf16.msra.mxu0 %v4973_v9  ;;  %v5060_v9 = vld [vmem:[#allocation8 + $0xc0] ss:$8 sps:$4 sm:$0xff]  }
 0x24f   : > { %3192 = vmatprep.subr.bf16.mxu0 %v4978_v11  ;;  %3466 = vmatpush1.bf16.msra.mxu1 %v5060_v9  ;;  %v5063_v11 = vld [vmem:[#allocation8 + $0xd0] ss:$8 sps:$4 sm:$0xff]  }
 0x250   : > { %3467 = vmatprep.subr.bf16.mxu1 %v5065_v10 }
 0x251   : > { %3184 = vmatmul.mubr.bf16.vlgmr.msra.gmra.mrb[0].mxu0 %v421_v13 }
 0x252   : > { %3193 = vmatpush1.bf16.msra.mxu0 %v4976_v14  ;;  %3224 = vmatprep.mubr.bf16.mxu0 %v424_v15  ;;  %v5066_v14 = vld [vmem:[#allocation8 + $0xe0] ss:$8 sps:$4 sm:$0xff]  }
 0x253   : > { %3194 = vmatprep.subr.bf16.mxu0 %v4981_v16  ;;  %3468 = vmatpush1.bf16.msra.mxu1 %v5063_v11 }
 0x254   : > { %3469 = vmatprep.subr.bf16.mxu1 %v5068_v12 }
 0x256   : > { %3195 = vmatpush1.bf16.msra.mxu0 %v4979_v17 }
 0x257   : > { %3196 = vmatprep.subr.bf16.mxu0 %v4984_v18  ;;  %3470 = vmatpush1.bf16.msra.mxu1 %v5066_v14  ;;  %v5071_v18 = vld [vmem:[#allocation8 + $0xf4] ss:$8 sps:$4 sm:$0xff]  }
 0x258   : > { %3471 = vmatprep.subr.bf16.mxu1 %v5071_v18 }
 0x25a   : > { %3197 = vmatpush1.bf16.msra.mxu0 %v4982_v19  ;;  %v5069_v19 = vld [vmem:[#allocation8 + $0xf0] ss:$8 sps:$4 sm:$0xff]  }
 0x25b   : > { %3198 = vmatprep.subr.bf16.mxu0 %v4987_v20  ;;  %3472 = vmatpush1.bf16.msra.mxu1 %v5069_v19  ;;  %v5072_v20 = vld [vmem:[#allocation11 + $0x40] sm:$0xff]  }
 0x25c   : > { %4268 = vmatprep.subr.bf16.mxu1 %v5072_v20 }
 0x25e   : > { %3199 = vmatpush1.bf16.msra.mxu0 %v4985_v21  ;;  %v811_v21 = vlaneseq }
 0x25f   : > { %3200 = vmatprep.subr.bf16.mxu0 %v4990_v22 }
 0x260   : > { %v812_v22 = vshrl.u32 %v811_v21, 7 }
 0x262   : > { %3201 = vmatpush1.bf16.msra.mxu0 %v4988_v23  ;;  %v813_v23 = vsub.s32 0, %v812_v22 }
 0x263   : > { %3202 = vmatprep.subr.bf16.mxu0 %v4993_v24  ;;  %v809_v24 = vld [vmem:[#allocation7] sm:$0x3] }
 0x266   : > { %3203 = vmatpush1.bf16.msra.mxu0 %v4991_v25  ;;  %v817_v25 = vsub.s32 1, %v812_v22 }
 0x267   : > { %3204 = vmatprep.subr.bf16.mxu0 %v4996_v26  ;;  %v814_v26 = vrot.slane %v809_v24, %v813_v23 }
 0x268   : > { %v3278_v57 = vrot.slane %v3269_v55, %v817_v25 }
 0x26a   : > { %3205 = vmatpush1.bf16.msra.mxu0 %v4994_v27  ;;  %v818_v27 = vrot.slane %v809_v24, %v817_v25 }
 0x26b   : > { %3206 = vmatprep.subr.bf16.mxu0 %v4999_v28 }
 0x26e   : > { %3207 = vmatpush1.bf16.msra.mxu0 %v4997_v32 }
 0x26f   : > { %3208 = vmatprep.subr.bf16.mxu0 %v5002_v34 }
 0x272   : > { %3209 = vmatpush1.bf16.msra.mxu0 %v5000_v36 }
 0x273   : > { %3210 = vmatprep.subr.bf16.mxu0 %v5005_v38 }
 0x276   : > { %3211 = vmatpush1.bf16.msra.mxu0 %v5003_v40 }
 0x277   : > { %3212 = vmatprep.subr.bf16.mxu0 %v5008_v42  ;;  %v5075_v42 = vld [vmem:[#allocation11 + $0x8] sm:$0xff]  }
 0x27a   : > { %3213 = vmatpush1.bf16.msra.mxu0 %v5006_v44  ;;  %v5077_v44 = vld [vmem:[#allocation11 + $0x10] sm:$0xff]  }
 0x27b   : > { %3214 = vmatprep.subr.bf16.mxu0 %v5011_v46  ;;  %v5079_v46 = vld [vmem:[#allocation11 + $0x18] sm:$0xff]  }
 0x27e   : > { %3215 = vmatpush1.bf16.msra.mxu0 %v5009_v48  ;;  %v5081_v48 = vld [vmem:[#allocation11 + $0x20] sm:$0xff]  }
 0x27f   : > { %3216 = vmatprep.subr.bf16.mxu0 %v5014_v50  ;;  %v5083_v50 = vld [vmem:[#allocation11 + $0x28] sm:$0xff]  }
 0x282   : > { %3217 = vmatpush1.bf16.msra.mxu0 %v5012_v52  ;;  %v5085_v52 = vld [vmem:[#allocation11 + $0x30] sm:$0xff]  }
 0x283   : > { %3218 = vmatprep.subr.bf16.mxu0 %v5017_v54  ;;  %v5087_v54 = vld [vmem:[#allocation11 + $0x38] sm:$0xff]  }
 0x286   : > { %3219 = vmatpush1.bf16.msra.mxu0 %v5015_v56  ;;  %v3274_v56 = vrot.slane %v3269_v55, %v813_v23 }
 0x287   : > { %3220 = vmatprep.subr.bf16.mxu0 %v5020_v58 }
 0x28a   : > { %3221 = vmatpush1.bf16.msra.mxu0 %v5018_v60 }
 0x28b   : > { %3222 = vmatprep.subr.bf16.mxu0 %v5023_v62 }
 0x28e   : > { %3223 = vmatpush1.bf16.msra.mxu0 %v5021_v0 }
 0x291   : > { %3225 = vmatmul.mubr.bf16.vlgmr.msra.gmra.mrb[0].mxu0 %v423_v4 }
 0x2e3   : > { %v2939_v13 = vpop.f32.mrb[0].mxu1 }
 0x2e4   : > { %v2941_v15 = vpop.f32.mrb[1].mxu1  ;;  %v4290_v28 = vadd.f32 %v2939_v13, %v814_v26 }
 0x2e5   : > { %v2943_v16 = vpop.f32.mrb[2].mxu1  ;;  %v4292_v29 = vadd.f32 %v2941_v15, %v818_v27 }
 0x2e6   : > { %v2944_v17 = vpop.f32.mrb[3].mxu1 }
 0x364   : > { %v3226_v30 = vpop.f32.mrb[0].mxu0 }
 0x365   : > { %v4291_v31 = vadd.f32 %v4290_v28, %v3226_v30  ;;  %v3228_v32 = vpop.f32.mrb[1].mxu0 }
 0x366   : > { %v4293_v33 = vadd.f32 %v4292_v29, %v3228_v32  ;;  %v3230_v34 = vpop.f32.mrb[2].mxu0 }
 0x367   : > { %v3233_v35 = vmax.f32 %v4291_v31, 0.0  ;;  %v3231_v36 = vpop.f32.mrb[3].mxu0 }
 0x368   : > { %v3234_v37 = vmax.f32 %v4293_v33, 0.0 }
 0x369   : > { %v3235_v40 = vpack.c.bf16 %v3233_v35, %v3233_v35 }
 0x36a   : > { %v3236_v38 = vpack.c.bf16 %v3234_v37, %v3234_v37 }
 0x36c   : > { %3473 = vmatprep.mubr.bf16.mxu1 %v3236_v38 }
 0x36d   : > { %3474 = vmatmul.mubr.bf16.vlgmr.msra.gmra.mrb[4].mxu1 %v3235_v40 }
 0x36e   : > { %4269 = vmatpush3.bf16.msra.mxu1 %v5073_v39 }
 0x36f   : > { %4270 = vmatprep.subr.bf16.mxu1 %v5074_v41 }
 0x372   : > { %4271 = vmatpush3.bf16.msra.mxu1 %v5075_v42 }
 0x373   : > { %4272 = vmatprep.subr.bf16.mxu1 %v5076_v43 }
 0x376   : > { %4273 = vmatpush3.bf16.msra.mxu1 %v5077_v44 }
 0x377   : > { %4274 = vmatprep.subr.bf16.mxu1 %v5078_v45 }
 0x37a   : > { %4275 = vmatpush3.bf16.msra.mxu1 %v5079_v46 }
 0x37b   : > { %4276 = vmatprep.subr.bf16.mxu1 %v5080_v47 }
 0x37e   : > { %4277 = vmatpush3.bf16.msra.mxu1 %v5081_v48 }
 0x37f   : > { %4278 = vmatprep.subr.bf16.mxu1 %v5082_v49 }
 0x382   : > { %4279 = vmatpush3.bf16.msra.mxu1 %v5083_v50 }
 0x383   : > { %4280 = vmatprep.subr.bf16.mxu1 %v5084_v51 }
 0x386   : > { %4281 = vmatpush3.bf16.msra.mxu1 %v5085_v52 }
 0x387   : > { %4282 = vmatprep.subr.bf16.mxu1 %v5086_v53 }
 0x38a   : > { %4283 = vmatpush3.bf16.msra.mxu1 %v5087_v54 }
 0x440   : > { %v3475_v58 = vpop.f32.mrb[4].mxu1 }
 0x441   : > { %v3476_v59 = vadd.f32 %v3475_v58, %v3274_v56  ;;  %v3477_v60 = vpop.f32.mrb[5].mxu1 }
 0x442   : > { %v3478_v61 = vadd.f32 %v3477_v60, %v3278_v57  ;;  %v3479_v62 = vpop.f32.mrb[6].mxu1 }
 0x443   : > { %v3482_v63 = vmax.f32 %v3476_v59, 0.0  ;;  %v3480_v0 = vpop.f32.mrb[7].mxu1 }
 0x444   : > { %v3483_v1 = vmax.f32 %v3478_v61, 0.0 }
 0x445   : > { %v3484_v3 = vpack.c.bf16 %v3482_v63, %v3482_v63 }
 0x446   : > { %v3485_v2 = vpack.c.bf16 %v3483_v1, %v3483_v1 }
 0x448   : > { %3653 = vmatprep.mubr.bf16.mxu1 %v3485_v2 }
 0x449   : > { %3654 = vmatmul.mubr.bf16.vlgmr.msra.gmra.mrb[8].mxu1 %v3484_v3 }
 0x51c   : > { %v4284_v4 = vpop.f32.mrb[8].mxu1 }
 0x51d   : > { %v4285_v5 = vpop.f32.mrb[9].mxu1 }
 0x51e   : > { %v4286_v7 = vadd.f32 %v4285_v5, %v4284_v4  ;;  %v4287_v8 = vpop.f32.mrb[10].mxu1 }
 0x51f   : > { %v4288_v9 = vpop.f32.mrb[11].mxu1 }
 0x520   : > { %v3656_v10 = vadd.f32 %v4286_v7, %v4247_v6 }
 0x522   : > { %3661 = vmax.xlane.f32.xlu0 %v3656_v10 }
 0x5af   : > { %v3662_v11 = vpop.xlane.xlu0 %3661 }
 0x5b0   : > { %v3663_v12 = vsub.f32 %v3656_v10, %v3662_v11 }
 0x5b2   : > { %v3664_v13 = vmul.f32 1.442695, %v3663_v12 }
 0x5b4   : > { %5088 = vpow2.f32 %v3664_v13 }
 0x5be   : > { %v5089_v14 = vpop.eup %5088 }
 0x5bf   : > { %3666 = vadd.xlane.f32.xlu0 %v5089_v14 }
 0x64c   : > { %v3667_v15 = vpop.xlane.xlu0 %3666 }
 0x64d   : > { %5090 = vlog2.f32 %v3667_v15 }
 0x657   : > { %v5091_v16 = vpop.eup %5090 }
 0x658   : > { %v3669_v17 = vmul.f32 0.6931472, %v5091_v16 }
 0x65a   : > { %v3670_v18 = vsub.f32 %v3663_v12, %v3669_v17 }
 0x65c   : > { %3671 = vst [vmem:[%s375_s21] sm:$0xff] %v3670_v18 }
 0x65d   : > { %5303 = shalt.err (!%p5300_p0)
}
 0x65e   : > { %s5304_s19 = scalar_lea.hbm %s5719_s22, 128  ;;  %s5308_s29 = scalar_lea.hbm %s5770_s7, 256 }
 0x65f   : > { %p5305_p4 = scmp.ne.s32.totalorder %s5719_s22, %s5304_s19  ;;  %p5309_p8 = scmp.lt.u32.totalorder %s5719_s22, %s5770_s7 }
 0x660   : > { %p5310_p6 = scmp.lt.u32.totalorder %s5308_s29, %s5304_s19  ;;  %p5312_p5 = scmp.lt.u32.totalorder %s5304_s19, %s5719_s22 }
 0x661   : > { %p5306_p10 = pnand %p5305_p4, %p5791_p9 }
 0x662   : > { %p5311_p7 = por %p5310_p6, %p5309_p8 }
 0x663   : > { %p5307_p11 = pneg %p5306_p10 }
 0x664   : > { %p5313_p12 = por %p5312_p5, %p5311_p7 }
 0x666   : > { %p5314_p13 = pnand %p5313_p12, %p5307_p11 }
 0x668   : > { %5317 = shalt.err (!%p5314_p13)
}
 0x669   : > { %4363 = dma.vmem_to_hbm [thread:$0]  (%p5791_p9), %s5721_s14, 128, %s5719_s22, %s3673_s10  }
 0x66a PF: > { %s3698_s21 = sand.u32 1, %s5356_s24   ;;  %p5792_p1 = scmp.ne.s32.totalorder %s5782_s23, 0 }
 0x66b   : > { %p5793_p3 = scmp.ge.s32.totalorder %s5368_s27, 2  ;;  %s3699_s15 = scalar_lea.sflag [#allocation4], %s3698_s21 }
 0x66d   : > { %p4389_p2 = pnand %p5793_p3, %p5792_p1 }
 0x66f   : > { %5351 = dma.done.wait (!%p4389_p2), %s3699_s15, 128  }
 0x670   : > { %5353 = vsyncadd (!%p4389_p2), %s3699_s15, 4294967168  ;;  %p23_p0 = scmp.ge.s32.totalorder %s5598_s11, 4   ;;  %s5794_s24 = smov %s5360_s25 }
 0x671   : > { %s5795_s25 = smov %s5364_s26  ;;  %s5796_s26 = smov %s5609_s18 }
 0x672   : > { %s5797_s27 = smov %s5598_s11  ;;  %25 = sbr.rel (!%p23_p0) target bundleno = 10 (0xa), region = 117 }
 0x679   :  { %3704 = vsyncpa [#allocation3], 1 }
 0x67a   :  { %3706 = vsyncpa [#allocation3 + $0x1], 1 }
 0x67b   :  { %3707 = vsyncpa [#allocation6], 1 }
 0x67c   :  { %3708 = vsyncpa [#allocation9], 1 }
 0x67d   :  { %3709 = vsyncpa [#allocation12], 1 }
 0x67e   :  { %3710 = vsyncpa [#allocation4], 1 }
 0x67f   :  { %3712 = vsyncpa [#allocation4 + $0x1], 1 }

</bundles_post_ra>
